<compile_context>
chip_gen: v7x
topology: tpu7x:2x2x1
jax: 0.10.0
libtpu: 0.0.40
codegen_flags: <defaults>
</compile_context>

<pallas_src>
import functools

import jax
import jax.numpy as jnp
from jax.experimental import pallas as pl
from jax.experimental.pallas import tpu as pltpu

EPS = 1e-5


# --------------------------------------------------------------------------
# in-kernel helpers
# --------------------------------------------------------------------------
def _lane_shift(a, off, length):
    """out[..., p] = a[..., (p + off) % length] for a static, nonzero int off."""
    k = off % length
    return jnp.concatenate([a[..., k:], a[..., :k]], axis=-1)


def _batchnorm(pre, gamma, beta, relu):
    """Train-mode BN over the lane axis (= N*H*W), biased variance, centered."""
    mean = jnp.mean(pre, axis=1, keepdims=True)                    # (C,1)
    var = jnp.mean(jnp.square(pre - mean), axis=1, keepdims=True)  # (C,1)
    y = (pre - mean) * (gamma * jax.lax.rsqrt(var + EPS)) + beta
    return jnp.maximum(y, 0.0) if relu else y


# --------------------------------------------------------------------------
# fused kernel: DWConv3x3 -> BN -> ReLU -> Conv3x3(dil=2) -> BN -> ReLU
#               -> Conv1x1 -> BN
# activations are (C, L) with L = N*H*W flattened on the lane axis.
# --------------------------------------------------------------------------
def _context_kernel(x_ref, wdw_ref, bdw_ref, g1_ref, bt1_ref,
                    w2_ref, b2_ref, g2_ref, bt2_ref,
                    w3_ref, b3_ref, g3_ref, bt3_ref,
                    mdw_ref, mdil_ref, out_ref, *, W):
    C, L = x_ref.shape
    Cout = out_ref.shape[0]
    x = x_ref[...].astype(jnp.float32)          # cast in-kernel, no wrapper copy

    # ---- stage 1: depthwise 3x3 conv (pad=1) + BN1 + ReLU ------------------
    acc1 = jnp.zeros((C, L), jnp.float32)
    for kh in range(3):
        for kw in range(3):
            t = kh * 3 + kw
            off = (kh - 1) * W + (kw - 1)
            s = x if off == 0 else _lane_shift(x, off, L) * mdw_ref[t]
            acc1 = acc1 + wdw_ref[t] * s                       # (C,1)*(C,L)
    a1 = _batchnorm(acc1 + bdw_ref[...], g1_ref[...], bt1_ref[...], relu=True)

    # ---- stage 2: dense 3x3 conv, dilation=2 (pad=2) + BN2 + ReLU ----------
    acc2 = jnp.zeros((C, L), jnp.float32)
    for kh in range(3):
        for kw in range(3):
            t = kh * 3 + kw
            off = 2 * (kh - 1) * W + 2 * (kw - 1)
            s = a1 if off == 0 else _lane_shift(a1, off, L) * mdil_ref[t]
            for ci in range(C):                                # VPU MACs (C=4)
                acc2 = acc2 + w2_ref[t * C + ci] * s[ci:ci + 1, :]
    a2 = _batchnorm(acc2 + b2_ref[...], g2_ref[...], bt2_ref[...], relu=True)

    # ---- stage 3: 1x1 projection + BN3 (no ReLU) ---------------------------
    acc3 = jnp.zeros((Cout, L), jnp.float32)
    for ci in range(C):
        acc3 = acc3 + w3_ref[ci] * a2[ci:ci + 1, :]            # (Cout,1)*(1,L)
    out_ref[...] = _batchnorm(acc3 + b3_ref[...], g3_ref[...], bt3_ref[...],
                              relu=False)


# --------------------------------------------------------------------------
# wrapper
# --------------------------------------------------------------------------
def context_extraction(x, params):
    """x: (N, C, H, W). Returns (N, C_out, H, W) float32 (train-mode BN)."""
    N, C, H, W = x.shape
    L = N * H * W
    f32 = jnp.float32

    (w_dw, b_dw, g1, bt1, w2, b2, g2, bt2, w3, b3, g3, bt3) = params
    Cout = w3.shape[0]

    # --- layout plumbing (outside the kernel) ---
    # activations: channels on sublanes, batch*spatial flattened onto lanes.
    x_flat = jnp.transpose(x, (1, 0, 2, 3)).reshape(C, L)

    # depthwise (C,1,3,3) -> (9, C, 1), tap-major per-channel slabs
    wdw_r = jnp.transpose(w_dw.reshape(C, 9), (1, 0)).reshape(9, C, 1).astype(f32)
    # dense dilated (C, C, 3, 3) -> (9*Cin, C, 1), index = tap*Cin + ci
    w2_r = jnp.transpose(w2, (2, 3, 1, 0)).reshape(9 * C, C, 1).astype(f32)
    # 1x1 (Cout, Cin, 1, 1) -> (Cin, Cout, 1)
    w3_r = jnp.transpose(w3[:, :, 0, 0], (1, 0)).reshape(C, Cout, 1).astype(f32)

    def col(v):                                  # (C,) -> (C,1)
        return v.reshape(-1, 1).astype(f32)

    # per-tap boundary-validity masks on the flattened axis, tiled over N
    def masks(d):
        hh = jnp.arange(H, dtype=jnp.int32).reshape(H, 1)
        ww = jnp.arange(W, dtype=jnp.int32).reshape(1, W)
        rows = []
        for kh in range(3):
            for kw in range(3):
                dh, dw = (kh - 1) * d, (kw - 1) * d
                valid = ((hh + dh >= 0) & (hh + dh < H) &
                         (ww + dw >= 0) & (ww + dw < W)).astype(f32)
                rows.append(jnp.tile(valid.reshape(1, H * W), (1, N)))
        return jnp.stack(rows, axis=0)           # (9, 1, L)

    out_flat = pl.pallas_call(
        functools.partial(_context_kernel, W=W),
        out_shape=jax.ShapeDtypeStruct((Cout, L), f32),
        compiler_params=pltpu.CompilerParams(vmem_limit_bytes=32 * 1024 * 1024),
    )(x_flat, wdw_r, col(b_dw), col(g1), col(bt1),
      w2_r, col(b2), col(g2), col(bt2),
      w3_r, col(b3), col(g3), col(bt3),
      masks(1), masks(2))

    return jnp.transpose(out_flat.reshape(Cout, N, H, W), (1, 0, 2, 3))


# --------------------------------------------------------------------------
# pure-JAX reference (PyTorch-equivalent, train-mode BN)
# --------------------------------------------------------------------------
def _reference(x, params):
    (w_dw, b_dw, g1, bt1, w2, b2, g2, bt2, w3, b3, g3, bt3) = params
    x = x.astype(jnp.float32)
    C = x.shape[1]

    def conv(v, w, b, pad, dil=1, groups=1):
        out = jax.lax.conv_general_dilated(
            v, w, window_strides=(1, 1),
            padding=((pad, pad), (pad, pad)),
            rhs_dilation=(dil, dil),
            dimension_numbers=("NCHW", "OIHW", "NCHW"),
            feature_group_count=groups,
            precision=jax.lax.Precision.HIGHEST)
        return out + b[None, :, None, None]

    def bn(v, g, bt):
        mu = jnp.mean(v, axis=(0, 2, 3), keepdims=True)
        var = jnp.mean((v - mu) ** 2, axis=(0, 2, 3), keepdims=True)
        return (g[None, :, None, None] * (v - mu) * jax.lax.rsqrt(var + EPS)
                + bt[None, :, None, None])

    y = conv(x, w_dw, b_dw, 1, 1, groups=C)
    y = jax.nn.relu(bn(y, g1, bt1))
    y = conv(y, w2, b2, 2, 2)
    y = jax.nn.relu(bn(y, g2, bt2))
    y = conv(y, w3, b3, 0)
    y = bn(y, g3, bt3)
    return y


if __name__ == "__main__":
    key = jax.random.PRNGKey(0)
    ks = jax.random.split(key, 12)
    N, C, H, W = 2, 4, 16, 16          # dim=4, reduction=None -> C_out = C

    x = jax.random.normal(ks[0], (N, C, H, W), dtype=jnp.float32)

    w_dw = jax.random.normal(ks[1], (C, 1, 3, 3), jnp.float32) * 0.3
    b_dw = jax.random.normal(ks[2], (C,), jnp.float32) * 0.1
    g1 = 1.0 + 0.1 * jax.random.normal(ks[3], (C,), jnp.float32)
    bt1 = 0.1 * jax.random.normal(ks[4], (C,), jnp.float32)
    w2 = jax.random.normal(ks[5], (C, C, 3, 3), jnp.float32) * 0.2
    b2 = jax.random.normal(ks[6], (C,), jnp.float32) * 0.1
    g2 = 1.0 + 0.1 * jax.random.normal(ks[7], (C,), jnp.float32)
    bt2 = 0.1 * jax.random.normal(ks[8], (C,), jnp.float32)
    w3 = jax.random.normal(ks[9], (C, C, 1, 1), jnp.float32) * 0.3
    b3 = jax.random.normal(ks[10], (C,), jnp.float32) * 0.1
    g3 = 1.0 + 0.1 * jax.random.normal(ks[11], (C,), jnp.float32)
    bt3 = jnp.zeros((C,), jnp.float32)

    params = (w_dw, b_dw, g1, bt1, w2, b2, g2, bt2, w3, b3, g3, bt3)

    out = context_extraction(x, params)
    out = jax.block_until_ready(out)

    ref = _reference(x, params)
    assert out.shape == (N, C, H, W)
    max_err = jnp.max(jnp.abs(out - ref))
    assert jnp.allclose(out, ref, atol=1e-3, rtol=1e-3), f"max abs err {max_err}"

    print("KERNEL_OK")
</pallas_src>

<mosaic_0001>
module attributes {stable_mosaic.version = 11 : i64} {
  func.func @_context_kernel(%arg0: memref<4x512xf32, #tpu.memory_space<vmem>>, %arg1: memref<9x4x1xf32, #tpu.memory_space<vmem>>, %arg2: memref<4x1xf32, #tpu.memory_space<vmem>>, %arg3: memref<4x1xf32, #tpu.memory_space<vmem>>, %arg4: memref<4x1xf32, #tpu.memory_space<vmem>>, %arg5: memref<36x4x1xf32, #tpu.memory_space<vmem>>, %arg6: memref<4x1xf32, #tpu.memory_space<vmem>>, %arg7: memref<4x1xf32, #tpu.memory_space<vmem>>, %arg8: memref<4x1xf32, #tpu.memory_space<vmem>>, %arg9: memref<4x4x1xf32, #tpu.memory_space<vmem>>, %arg10: memref<4x1xf32, #tpu.memory_space<vmem>>, %arg11: memref<4x1xf32, #tpu.memory_space<vmem>>, %arg12: memref<4x1xf32, #tpu.memory_space<vmem>>, %arg13: memref<9x1x512xf32, #tpu.memory_space<vmem>>, %arg14: memref<9x1x512xf32, #tpu.memory_space<vmem>>, %arg15: memref<4x512xf32, #tpu.memory_space<vmem>>) attributes {dimension_semantics = [], scalar_prefetch = 0 : i64, scratch_operands = 0 : i64, tpu.core_type = #tpu.core_type<tc>} {
    %c0 = arith.constant 0 : index
    %c0_0 = arith.constant 0 : index
    %0 = vector.load %arg0[%c0, %c0_0] : memref<4x512xf32, #tpu.memory_space<vmem>>, vector<4x512xf32>
    %cst = arith.constant 0.000000e+00 : f32
    %1 = vector.broadcast %cst : f32 to vector<4x512xf32>
    %2 = vector.extract_strided_slice %0 {offsets = [0, 495], sizes = [4, 17], strides = [1, 1]} : vector<4x512xf32> to vector<4x17xf32>
    %3 = vector.extract_strided_slice %0 {offsets = [0, 0], sizes = [4, 495], strides = [1, 1]} : vector<4x512xf32> to vector<4x495xf32>
    %4 = tpu.concatenate %2, %3 in 1 : vector<4x17xf32>, vector<4x495xf32> -> vector<4x512xf32>
    %c0_1 = arith.constant 0 : index
    %c0_2 = arith.constant 0 : index
    %c0_3 = arith.constant 0 : index
    %5 = vector.load %arg13[%c0_1, %c0_2, %c0_3] : memref<9x1x512xf32, #tpu.memory_space<vmem>>, vector<1x1x512xf32>
    %6 = vector.shape_cast %5 : vector<1x1x512xf32> to vector<1x512xf32>
    %7 = vector.broadcast %6 : vector<1x512xf32> to vector<4x512xf32>
    %8 = arith.mulf %4, %7 : vector<4x512xf32>
    %c0_4 = arith.constant 0 : index
    %c0_5 = arith.constant 0 : index
    %c0_6 = arith.constant 0 : index
    %9 = vector.load %arg1[%c0_4, %c0_5, %c0_6] : memref<9x4x1xf32, #tpu.memory_space<vmem>>, vector<1x4x1xf32>
    %10 = vector.shape_cast %9 : vector<1x4x1xf32> to vector<4x1xf32>
    %11 = vector.broadcast %10 : vector<4x1xf32> to vector<4x512xf32>
    %12 = arith.mulf %11, %8 : vector<4x512xf32>
    %13 = arith.addf %1, %12 : vector<4x512xf32>
    %14 = vector.extract_strided_slice %0 {offsets = [0, 496], sizes = [4, 16], strides = [1, 1]} : vector<4x512xf32> to vector<4x16xf32>
    %15 = vector.extract_strided_slice %0 {offsets = [0, 0], sizes = [4, 496], strides = [1, 1]} : vector<4x512xf32> to vector<4x496xf32>
    %16 = tpu.concatenate %14, %15 in 1 : vector<4x16xf32>, vector<4x496xf32> -> vector<4x512xf32>
    %c1 = arith.constant 1 : index
    %c0_7 = arith.constant 0 : index
    %c0_8 = arith.constant 0 : index
    %17 = vector.load %arg13[%c1, %c0_7, %c0_8] : memref<9x1x512xf32, #tpu.memory_space<vmem>>, vector<1x1x512xf32>
    %18 = vector.shape_cast %17 : vector<1x1x512xf32> to vector<1x512xf32>
    %19 = vector.broadcast %18 : vector<1x512xf32> to vector<4x512xf32>
    %20 = arith.mulf %16, %19 : vector<4x512xf32>
    %c1_9 = arith.constant 1 : index
    %c0_10 = arith.constant 0 : index
    %c0_11 = arith.constant 0 : index
    %21 = vector.load %arg1[%c1_9, %c0_10, %c0_11] : memref<9x4x1xf32, #tpu.memory_space<vmem>>, vector<1x4x1xf32>
    %22 = vector.shape_cast %21 : vector<1x4x1xf32> to vector<4x1xf32>
    %23 = vector.broadcast %22 : vector<4x1xf32> to vector<4x512xf32>
    %24 = arith.mulf %23, %20 : vector<4x512xf32>
    %25 = arith.addf %13, %24 : vector<4x512xf32>
    %26 = vector.extract_strided_slice %0 {offsets = [0, 497], sizes = [4, 15], strides = [1, 1]} : vector<4x512xf32> to vector<4x15xf32>
    %27 = vector.extract_strided_slice %0 {offsets = [0, 0], sizes = [4, 497], strides = [1, 1]} : vector<4x512xf32> to vector<4x497xf32>
    %28 = tpu.concatenate %26, %27 in 1 : vector<4x15xf32>, vector<4x497xf32> -> vector<4x512xf32>
    %c2 = arith.constant 2 : index
    %c0_12 = arith.constant 0 : index
    %c0_13 = arith.constant 0 : index
    %29 = vector.load %arg13[%c2, %c0_12, %c0_13] : memref<9x1x512xf32, #tpu.memory_space<vmem>>, vector<1x1x512xf32>
    %30 = vector.shape_cast %29 : vector<1x1x512xf32> to vector<1x512xf32>
    %31 = vector.broadcast %30 : vector<1x512xf32> to vector<4x512xf32>
    %32 = arith.mulf %28, %31 : vector<4x512xf32>
    %c2_14 = arith.constant 2 : index
    %c0_15 = arith.constant 0 : index
    %c0_16 = arith.constant 0 : index
    %33 = vector.load %arg1[%c2_14, %c0_15, %c0_16] : memref<9x4x1xf32, #tpu.memory_space<vmem>>, vector<1x4x1xf32>
    %34 = vector.shape_cast %33 : vector<1x4x1xf32> to vector<4x1xf32>
    %35 = vector.broadcast %34 : vector<4x1xf32> to vector<4x512xf32>
    %36 = arith.mulf %35, %32 : vector<4x512xf32>
    %37 = arith.addf %25, %36 : vector<4x512xf32>
    %38 = vector.extract_strided_slice %0 {offsets = [0, 511], sizes = [4, 1], strides = [1, 1]} : vector<4x512xf32> to vector<4x1xf32>
    %39 = vector.extract_strided_slice %0 {offsets = [0, 0], sizes = [4, 511], strides = [1, 1]} : vector<4x512xf32> to vector<4x511xf32>
    %40 = tpu.concatenate %38, %39 in 1 : vector<4x1xf32>, vector<4x511xf32> -> vector<4x512xf32>
    %c3 = arith.constant 3 : index
    %c0_17 = arith.constant 0 : index
    %c0_18 = arith.constant 0 : index
    %41 = vector.load %arg13[%c3, %c0_17, %c0_18] : memref<9x1x512xf32, #tpu.memory_space<vmem>>, vector<1x1x512xf32>
    %42 = vector.shape_cast %41 : vector<1x1x512xf32> to vector<1x512xf32>
    %43 = vector.broadcast %42 : vector<1x512xf32> to vector<4x512xf32>
    %44 = arith.mulf %40, %43 : vector<4x512xf32>
    %c3_19 = arith.constant 3 : index
    %c0_20 = arith.constant 0 : index
    %c0_21 = arith.constant 0 : index
    %45 = vector.load %arg1[%c3_19, %c0_20, %c0_21] : memref<9x4x1xf32, #tpu.memory_space<vmem>>, vector<1x4x1xf32>
    %46 = vector.shape_cast %45 : vector<1x4x1xf32> to vector<4x1xf32>
    %47 = vector.broadcast %46 : vector<4x1xf32> to vector<4x512xf32>
    %48 = arith.mulf %47, %44 : vector<4x512xf32>
    %49 = arith.addf %37, %48 : vector<4x512xf32>
    %c4 = arith.constant 4 : index
    %c0_22 = arith.constant 0 : index
    %c0_23 = arith.constant 0 : index
    %50 = vector.load %arg1[%c4, %c0_22, %c0_23] : memref<9x4x1xf32, #tpu.memory_space<vmem>>, vector<1x4x1xf32>
    %51 = vector.shape_cast %50 : vector<1x4x1xf32> to vector<4x1xf32>
    %52 = vector.broadcast %51 : vector<4x1xf32> to vector<4x512xf32>
    %53 = arith.mulf %52, %0 : vector<4x512xf32>
    %54 = arith.addf %49, %53 : vector<4x512xf32>
    %55 = vector.extract_strided_slice %0 {offsets = [0, 1], sizes = [4, 511], strides = [1, 1]} : vector<4x512xf32> to vector<4x511xf32>
    %56 = vector.extract_strided_slice %0 {offsets = [0, 0], sizes = [4, 1], strides = [1, 1]} : vector<4x512xf32> to vector<4x1xf32>
    %57 = tpu.concatenate %55, %56 in 1 : vector<4x511xf32>, vector<4x1xf32> -> vector<4x512xf32>
    %c5 = arith.constant 5 : index
    %c0_24 = arith.constant 0 : index
    %c0_25 = arith.constant 0 : index
    %58 = vector.load %arg13[%c5, %c0_24, %c0_25] : memref<9x1x512xf32, #tpu.memory_space<vmem>>, vector<1x1x512xf32>
    %59 = vector.shape_cast %58 : vector<1x1x512xf32> to vector<1x512xf32>
    %60 = vector.broadcast %59 : vector<1x512xf32> to vector<4x512xf32>
    %61 = arith.mulf %57, %60 : vector<4x512xf32>
    %c5_26 = arith.constant 5 : index
    %c0_27 = arith.constant 0 : index
    %c0_28 = arith.constant 0 : index
    %62 = vector.load %arg1[%c5_26, %c0_27, %c0_28] : memref<9x4x1xf32, #tpu.memory_space<vmem>>, vector<1x4x1xf32>
    %63 = vector.shape_cast %62 : vector<1x4x1xf32> to vector<4x1xf32>
    %64 = vector.broadcast %63 : vector<4x1xf32> to vector<4x512xf32>
    %65 = arith.mulf %64, %61 : vector<4x512xf32>
    %66 = arith.addf %54, %65 : vector<4x512xf32>
    %67 = vector.extract_strided_slice %0 {offsets = [0, 15], sizes = [4, 497], strides = [1, 1]} : vector<4x512xf32> to vector<4x497xf32>
    %68 = vector.extract_strided_slice %0 {offsets = [0, 0], sizes = [4, 15], strides = [1, 1]} : vector<4x512xf32> to vector<4x15xf32>
    %69 = tpu.concatenate %67, %68 in 1 : vector<4x497xf32>, vector<4x15xf32> -> vector<4x512xf32>
    %c6 = arith.constant 6 : index
    %c0_29 = arith.constant 0 : index
    %c0_30 = arith.constant 0 : index
    %70 = vector.load %arg13[%c6, %c0_29, %c0_30] : memref<9x1x512xf32, #tpu.memory_space<vmem>>, vector<1x1x512xf32>
    %71 = vector.shape_cast %70 : vector<1x1x512xf32> to vector<1x512xf32>
    %72 = vector.broadcast %71 : vector<1x512xf32> to vector<4x512xf32>
    %73 = arith.mulf %69, %72 : vector<4x512xf32>
    %c6_31 = arith.constant 6 : index
    %c0_32 = arith.constant 0 : index
    %c0_33 = arith.constant 0 : index
    %74 = vector.load %arg1[%c6_31, %c0_32, %c0_33] : memref<9x4x1xf32, #tpu.memory_space<vmem>>, vector<1x4x1xf32>
    %75 = vector.shape_cast %74 : vector<1x4x1xf32> to vector<4x1xf32>
    %76 = vector.broadcast %75 : vector<4x1xf32> to vector<4x512xf32>
    %77 = arith.mulf %76, %73 : vector<4x512xf32>
    %78 = arith.addf %66, %77 : vector<4x512xf32>
    %79 = vector.extract_strided_slice %0 {offsets = [0, 16], sizes = [4, 496], strides = [1, 1]} : vector<4x512xf32> to vector<4x496xf32>
    %80 = vector.extract_strided_slice %0 {offsets = [0, 0], sizes = [4, 16], strides = [1, 1]} : vector<4x512xf32> to vector<4x16xf32>
    %81 = tpu.concatenate %79, %80 in 1 : vector<4x496xf32>, vector<4x16xf32> -> vector<4x512xf32>
    %c7 = arith.constant 7 : index
    %c0_34 = arith.constant 0 : index
    %c0_35 = arith.constant 0 : index
    %82 = vector.load %arg13[%c7, %c0_34, %c0_35] : memref<9x1x512xf32, #tpu.memory_space<vmem>>, vector<1x1x512xf32>
    %83 = vector.shape_cast %82 : vector<1x1x512xf32> to vector<1x512xf32>
    %84 = vector.broadcast %83 : vector<1x512xf32> to vector<4x512xf32>
    %85 = arith.mulf %81, %84 : vector<4x512xf32>
    %c7_36 = arith.constant 7 : index
    %c0_37 = arith.constant 0 : index
    %c0_38 = arith.constant 0 : index
    %86 = vector.load %arg1[%c7_36, %c0_37, %c0_38] : memref<9x4x1xf32, #tpu.memory_space<vmem>>, vector<1x4x1xf32>
    %87 = vector.shape_cast %86 : vector<1x4x1xf32> to vector<4x1xf32>
    %88 = vector.broadcast %87 : vector<4x1xf32> to vector<4x512xf32>
    %89 = arith.mulf %88, %85 : vector<4x512xf32>
    %90 = arith.addf %78, %89 : vector<4x512xf32>
    %91 = vector.extract_strided_slice %0 {offsets = [0, 17], sizes = [4, 495], strides = [1, 1]} : vector<4x512xf32> to vector<4x495xf32>
    %92 = vector.extract_strided_slice %0 {offsets = [0, 0], sizes = [4, 17], strides = [1, 1]} : vector<4x512xf32> to vector<4x17xf32>
    %93 = tpu.concatenate %91, %92 in 1 : vector<4x495xf32>, vector<4x17xf32> -> vector<4x512xf32>
    %c8 = arith.constant 8 : index
    %c0_39 = arith.constant 0 : index
    %c0_40 = arith.constant 0 : index
    %94 = vector.load %arg13[%c8, %c0_39, %c0_40] : memref<9x1x512xf32, #tpu.memory_space<vmem>>, vector<1x1x512xf32>
    %95 = vector.shape_cast %94 : vector<1x1x512xf32> to vector<1x512xf32>
    %96 = vector.broadcast %95 : vector<1x512xf32> to vector<4x512xf32>
    %97 = arith.mulf %93, %96 : vector<4x512xf32>
    %c8_41 = arith.constant 8 : index
    %c0_42 = arith.constant 0 : index
    %c0_43 = arith.constant 0 : index
    %98 = vector.load %arg1[%c8_41, %c0_42, %c0_43] : memref<9x4x1xf32, #tpu.memory_space<vmem>>, vector<1x4x1xf32>
    %99 = vector.shape_cast %98 : vector<1x4x1xf32> to vector<4x1xf32>
    %100 = vector.broadcast %99 : vector<4x1xf32> to vector<4x512xf32>
    %101 = arith.mulf %100, %97 : vector<4x512xf32>
    %102 = arith.addf %90, %101 : vector<4x512xf32>
    %c0_44 = arith.constant 0 : index
    %c0_45 = arith.constant 0 : index
    %103 = vector.load %arg2[%c0_44, %c0_45] : memref<4x1xf32, #tpu.memory_space<vmem>>, vector<4x1xf32>
    %104 = vector.broadcast %103 : vector<4x1xf32> to vector<4x512xf32>
    %105 = arith.addf %102, %104 : vector<4x512xf32>
    %c0_46 = arith.constant 0 : index
    %c0_47 = arith.constant 0 : index
    %106 = vector.load %arg3[%c0_46, %c0_47] : memref<4x1xf32, #tpu.memory_space<vmem>>, vector<4x1xf32>
    %c0_48 = arith.constant 0 : index
    %c0_49 = arith.constant 0 : index
    %107 = vector.load %arg4[%c0_48, %c0_49] : memref<4x1xf32, #tpu.memory_space<vmem>>, vector<4x1xf32>
    %cst_50 = arith.constant dense<0.000000e+00> : vector<4xf32>
    %108 = vector.multi_reduction <add>, %105, %cst_50 [1] : vector<4x512xf32> to vector<4xf32>
    %109 = vector.shape_cast %108 : vector<4xf32> to vector<4x1xf32>
    %cst_51 = arith.constant 5.120000e+02 : f32
    %110 = vector.broadcast %cst_51 : f32 to vector<4x1xf32>
    %111 = arith.divf %109, %110 : vector<4x1xf32>
    %112 = vector.broadcast %111 : vector<4x1xf32> to vector<4x512xf32>
    %113 = arith.subf %105, %112 : vector<4x512xf32>
    %114 = arith.mulf %113, %113 : vector<4x512xf32>
    %cst_52 = arith.constant dense<0.000000e+00> : vector<4xf32>
    %115 = vector.multi_reduction <add>, %114, %cst_52 [1] : vector<4x512xf32> to vector<4xf32>
    %116 = vector.shape_cast %115 : vector<4xf32> to vector<4x1xf32>
    %cst_53 = arith.constant 5.120000e+02 : f32
    %117 = vector.broadcast %cst_53 : f32 to vector<4x1xf32>
    %118 = arith.divf %116, %117 : vector<4x1xf32>
    %119 = vector.broadcast %111 : vector<4x1xf32> to vector<4x512xf32>
    %120 = arith.subf %105, %119 : vector<4x512xf32>
    %cst_54 = arith.constant 9.99999974E-6 : f32
    %121 = vector.broadcast %cst_54 : f32 to vector<4x1xf32>
    %122 = arith.addf %118, %121 : vector<4x1xf32>
    %123 = math.rsqrt %122 : vector<4x1xf32>
    %124 = arith.mulf %106, %123 : vector<4x1xf32>
    %125 = vector.broadcast %124 : vector<4x1xf32> to vector<4x512xf32>
    %126 = arith.mulf %120, %125 : vector<4x512xf32>
    %127 = vector.broadcast %107 : vector<4x1xf32> to vector<4x512xf32>
    %128 = arith.addf %126, %127 : vector<4x512xf32>
    %cst_55 = arith.constant 0.000000e+00 : f32
    %129 = vector.broadcast %cst_55 : f32 to vector<4x512xf32>
    %130 = arith.maximumf %128, %129 : vector<4x512xf32>
    %cst_56 = arith.constant 0.000000e+00 : f32
    %131 = vector.broadcast %cst_56 : f32 to vector<4x512xf32>
    %132 = vector.extract_strided_slice %130 {offsets = [0, 478], sizes = [4, 34], strides = [1, 1]} : vector<4x512xf32> to vector<4x34xf32>
    %133 = vector.extract_strided_slice %130 {offsets = [0, 0], sizes = [4, 478], strides = [1, 1]} : vector<4x512xf32> to vector<4x478xf32>
    %134 = tpu.concatenate %132, %133 in 1 : vector<4x34xf32>, vector<4x478xf32> -> vector<4x512xf32>
    %c0_57 = arith.constant 0 : index
    %c0_58 = arith.constant 0 : index
    %c0_59 = arith.constant 0 : index
    %135 = vector.load %arg14[%c0_57, %c0_58, %c0_59] : memref<9x1x512xf32, #tpu.memory_space<vmem>>, vector<1x1x512xf32>
    %136 = vector.shape_cast %135 : vector<1x1x512xf32> to vector<1x512xf32>
    %137 = vector.broadcast %136 : vector<1x512xf32> to vector<4x512xf32>
    %138 = arith.mulf %134, %137 : vector<4x512xf32>
    %c0_60 = arith.constant 0 : index
    %c0_61 = arith.constant 0 : index
    %c0_62 = arith.constant 0 : index
    %139 = vector.load %arg5[%c0_60, %c0_61, %c0_62] : memref<36x4x1xf32, #tpu.memory_space<vmem>>, vector<1x4x1xf32>
    %140 = vector.shape_cast %139 : vector<1x4x1xf32> to vector<4x1xf32>
    %141 = vector.extract_strided_slice %138 {offsets = [0, 0], sizes = [1, 512], strides = [1, 1]} : vector<4x512xf32> to vector<1x512xf32>
    %142 = vector.broadcast %140 : vector<4x1xf32> to vector<4x512xf32>
    %143 = vector.broadcast %141 : vector<1x512xf32> to vector<4x512xf32>
    %144 = arith.mulf %142, %143 : vector<4x512xf32>
    %145 = arith.addf %131, %144 : vector<4x512xf32>
    %c1_63 = arith.constant 1 : index
    %c0_64 = arith.constant 0 : index
    %c0_65 = arith.constant 0 : index
    %146 = vector.load %arg5[%c1_63, %c0_64, %c0_65] : memref<36x4x1xf32, #tpu.memory_space<vmem>>, vector<1x4x1xf32>
    %147 = vector.shape_cast %146 : vector<1x4x1xf32> to vector<4x1xf32>
    %148 = vector.extract_strided_slice %138 {offsets = [1, 0], sizes = [1, 512], strides = [1, 1]} : vector<4x512xf32> to vector<1x512xf32>
    %149 = vector.broadcast %147 : vector<4x1xf32> to vector<4x512xf32>
    %150 = vector.broadcast %148 : vector<1x512xf32> to vector<4x512xf32>
    %151 = arith.mulf %149, %150 : vector<4x512xf32>
    %152 = arith.addf %145, %151 : vector<4x512xf32>
    %c2_66 = arith.constant 2 : index
    %c0_67 = arith.constant 0 : index
    %c0_68 = arith.constant 0 : index
    %153 = vector.load %arg5[%c2_66, %c0_67, %c0_68] : memref<36x4x1xf32, #tpu.memory_space<vmem>>, vector<1x4x1xf32>
    %154 = vector.shape_cast %153 : vector<1x4x1xf32> to vector<4x1xf32>
    %155 = vector.extract_strided_slice %138 {offsets = [2, 0], sizes = [1, 512], strides = [1, 1]} : vector<4x512xf32> to vector<1x512xf32>
    %156 = vector.broadcast %154 : vector<4x1xf32> to vector<4x512xf32>
    %157 = vector.broadcast %155 : vector<1x512xf32> to vector<4x512xf32>
    %158 = arith.mulf %156, %157 : vector<4x512xf32>
    %159 = arith.addf %152, %158 : vector<4x512xf32>
    %c3_69 = arith.constant 3 : index
    %c0_70 = arith.constant 0 : index
    %c0_71 = arith.constant 0 : index
    %160 = vector.load %arg5[%c3_69, %c0_70, %c0_71] : memref<36x4x1xf32, #tpu.memory_space<vmem>>, vector<1x4x1xf32>
    %161 = vector.shape_cast %160 : vector<1x4x1xf32> to vector<4x1xf32>
    %162 = vector.extract_strided_slice %138 {offsets = [3, 0], sizes = [1, 512], strides = [1, 1]} : vector<4x512xf32> to vector<1x512xf32>
    %163 = vector.broadcast %161 : vector<4x1xf32> to vector<4x512xf32>
    %164 = vector.broadcast %162 : vector<1x512xf32> to vector<4x512xf32>
    %165 = arith.mulf %163, %164 : vector<4x512xf32>
    %166 = arith.addf %159, %165 : vector<4x512xf32>
    %167 = vector.extract_strided_slice %130 {offsets = [0, 480], sizes = [4, 32], strides = [1, 1]} : vector<4x512xf32> to vector<4x32xf32>
    %168 = vector.extract_strided_slice %130 {offsets = [0, 0], sizes = [4, 480], strides = [1, 1]} : vector<4x512xf32> to vector<4x480xf32>
    %169 = tpu.concatenate %167, %168 in 1 : vector<4x32xf32>, vector<4x480xf32> -> vector<4x512xf32>
    %c1_72 = arith.constant 1 : index
    %c0_73 = arith.constant 0 : index
    %c0_74 = arith.constant 0 : index
    %170 = vector.load %arg14[%c1_72, %c0_73, %c0_74] : memref<9x1x512xf32, #tpu.memory_space<vmem>>, vector<1x1x512xf32>
    %171 = vector.shape_cast %170 : vector<1x1x512xf32> to vector<1x512xf32>
    %172 = vector.broadcast %171 : vector<1x512xf32> to vector<4x512xf32>
    %173 = arith.mulf %169, %172 : vector<4x512xf32>
    %c4_75 = arith.constant 4 : index
    %c0_76 = arith.constant 0 : index
    %c0_77 = arith.constant 0 : index
    %174 = vector.load %arg5[%c4_75, %c0_76, %c0_77] : memref<36x4x1xf32, #tpu.memory_space<vmem>>, vector<1x4x1xf32>
    %175 = vector.shape_cast %174 : vector<1x4x1xf32> to vector<4x1xf32>
    %176 = vector.extract_strided_slice %173 {offsets = [0, 0], sizes = [1, 512], strides = [1, 1]} : vector<4x512xf32> to vector<1x512xf32>
    %177 = vector.broadcast %175 : vector<4x1xf32> to vector<4x512xf32>
    %178 = vector.broadcast %176 : vector<1x512xf32> to vector<4x512xf32>
    %179 = arith.mulf %177, %178 : vector<4x512xf32>
    %180 = arith.addf %166, %179 : vector<4x512xf32>
    %c5_78 = arith.constant 5 : index
    %c0_79 = arith.constant 0 : index
    %c0_80 = arith.constant 0 : index
    %181 = vector.load %arg5[%c5_78, %c0_79, %c0_80] : memref<36x4x1xf32, #tpu.memory_space<vmem>>, vector<1x4x1xf32>
    %182 = vector.shape_cast %181 : vector<1x4x1xf32> to vector<4x1xf32>
    %183 = vector.extract_strided_slice %173 {offsets = [1, 0], sizes = [1, 512], strides = [1, 1]} : vector<4x512xf32> to vector<1x512xf32>
    %184 = vector.broadcast %182 : vector<4x1xf32> to vector<4x512xf32>
    %185 = vector.broadcast %183 : vector<1x512xf32> to vector<4x512xf32>
    %186 = arith.mulf %184, %185 : vector<4x512xf32>
    %187 = arith.addf %180, %186 : vector<4x512xf32>
    %c6_81 = arith.constant 6 : index
    %c0_82 = arith.constant 0 : index
    %c0_83 = arith.constant 0 : index
    %188 = vector.load %arg5[%c6_81, %c0_82, %c0_83] : memref<36x4x1xf32, #tpu.memory_space<vmem>>, vector<1x4x1xf32>
    %189 = vector.shape_cast %188 : vector<1x4x1xf32> to vector<4x1xf32>
    %190 = vector.extract_strided_slice %173 {offsets = [2, 0], sizes = [1, 512], strides = [1, 1]} : vector<4x512xf32> to vector<1x512xf32>
    %191 = vector.broadcast %189 : vector<4x1xf32> to vector<4x512xf32>
    %192 = vector.broadcast %190 : vector<1x512xf32> to vector<4x512xf32>
    %193 = arith.mulf %191, %192 : vector<4x512xf32>
    %194 = arith.addf %187, %193 : vector<4x512xf32>
    %c7_84 = arith.constant 7 : index
    %c0_85 = arith.constant 0 : index
    %c0_86 = arith.constant 0 : index
    %195 = vector.load %arg5[%c7_84, %c0_85, %c0_86] : memref<36x4x1xf32, #tpu.memory_space<vmem>>, vector<1x4x1xf32>
    %196 = vector.shape_cast %195 : vector<1x4x1xf32> to vector<4x1xf32>
    %197 = vector.extract_strided_slice %173 {offsets = [3, 0], sizes = [1, 512], strides = [1, 1]} : vector<4x512xf32> to vector<1x512xf32>
    %198 = vector.broadcast %196 : vector<4x1xf32> to vector<4x512xf32>
    %199 = vector.broadcast %197 : vector<1x512xf32> to vector<4x512xf32>
    %200 = arith.mulf %198, %199 : vector<4x512xf32>
    %201 = arith.addf %194, %200 : vector<4x512xf32>
    %202 = vector.extract_strided_slice %130 {offsets = [0, 482], sizes = [4, 30], strides = [1, 1]} : vector<4x512xf32> to vector<4x30xf32>
    %203 = vector.extract_strided_slice %130 {offsets = [0, 0], sizes = [4, 482], strides = [1, 1]} : vector<4x512xf32> to vector<4x482xf32>
    %204 = tpu.concatenate %202, %203 in 1 : vector<4x30xf32>, vector<4x482xf32> -> vector<4x512xf32>
    %c2_87 = arith.constant 2 : index
    %c0_88 = arith.constant 0 : index
    %c0_89 = arith.constant 0 : index
    %205 = vector.load %arg14[%c2_87, %c0_88, %c0_89] : memref<9x1x512xf32, #tpu.memory_space<vmem>>, vector<1x1x512xf32>
    %206 = vector.shape_cast %205 : vector<1x1x512xf32> to vector<1x512xf32>
    %207 = vector.broadcast %206 : vector<1x512xf32> to vector<4x512xf32>
    %208 = arith.mulf %204, %207 : vector<4x512xf32>
    %c8_90 = arith.constant 8 : index
    %c0_91 = arith.constant 0 : index
    %c0_92 = arith.constant 0 : index
    %209 = vector.load %arg5[%c8_90, %c0_91, %c0_92] : memref<36x4x1xf32, #tpu.memory_space<vmem>>, vector<1x4x1xf32>
    %210 = vector.shape_cast %209 : vector<1x4x1xf32> to vector<4x1xf32>
    %211 = vector.extract_strided_slice %208 {offsets = [0, 0], sizes = [1, 512], strides = [1, 1]} : vector<4x512xf32> to vector<1x512xf32>
    %212 = vector.broadcast %210 : vector<4x1xf32> to vector<4x512xf32>
    %213 = vector.broadcast %211 : vector<1x512xf32> to vector<4x512xf32>
    %214 = arith.mulf %212, %213 : vector<4x512xf32>
    %215 = arith.addf %201, %214 : vector<4x512xf32>
    %c9 = arith.constant 9 : index
    %c0_93 = arith.constant 0 : index
    %c0_94 = arith.constant 0 : index
    %216 = vector.load %arg5[%c9, %c0_93, %c0_94] : memref<36x4x1xf32, #tpu.memory_space<vmem>>, vector<1x4x1xf32>
    %217 = vector.shape_cast %216 : vector<1x4x1xf32> to vector<4x1xf32>
    %218 = vector.extract_strided_slice %208 {offsets = [1, 0], sizes = [1, 512], strides = [1, 1]} : vector<4x512xf32> to vector<1x512xf32>
    %219 = vector.broadcast %217 : vector<4x1xf32> to vector<4x512xf32>
    %220 = vector.broadcast %218 : vector<1x512xf32> to vector<4x512xf32>
    %221 = arith.mulf %219, %220 : vector<4x512xf32>
    %222 = arith.addf %215, %221 : vector<4x512xf32>
    %c10 = arith.constant 10 : index
    %c0_95 = arith.constant 0 : index
    %c0_96 = arith.constant 0 : index
    %223 = vector.load %arg5[%c10, %c0_95, %c0_96] : memref<36x4x1xf32, #tpu.memory_space<vmem>>, vector<1x4x1xf32>
    %224 = vector.shape_cast %223 : vector<1x4x1xf32> to vector<4x1xf32>
    %225 = vector.extract_strided_slice %208 {offsets = [2, 0], sizes = [1, 512], strides = [1, 1]} : vector<4x512xf32> to vector<1x512xf32>
    %226 = vector.broadcast %224 : vector<4x1xf32> to vector<4x512xf32>
    %227 = vector.broadcast %225 : vector<1x512xf32> to vector<4x512xf32>
    %228 = arith.mulf %226, %227 : vector<4x512xf32>
    %229 = arith.addf %222, %228 : vector<4x512xf32>
    %c11 = arith.constant 11 : index
    %c0_97 = arith.constant 0 : index
    %c0_98 = arith.constant 0 : index
    %230 = vector.load %arg5[%c11, %c0_97, %c0_98] : memref<36x4x1xf32, #tpu.memory_space<vmem>>, vector<1x4x1xf32>
    %231 = vector.shape_cast %230 : vector<1x4x1xf32> to vector<4x1xf32>
    %232 = vector.extract_strided_slice %208 {offsets = [3, 0], sizes = [1, 512], strides = [1, 1]} : vector<4x512xf32> to vector<1x512xf32>
    %233 = vector.broadcast %231 : vector<4x1xf32> to vector<4x512xf32>
    %234 = vector.broadcast %232 : vector<1x512xf32> to vector<4x512xf32>
    %235 = arith.mulf %233, %234 : vector<4x512xf32>
    %236 = arith.addf %229, %235 : vector<4x512xf32>
    %237 = vector.extract_strided_slice %130 {offsets = [0, 510], sizes = [4, 2], strides = [1, 1]} : vector<4x512xf32> to vector<4x2xf32>
    %238 = vector.extract_strided_slice %130 {offsets = [0, 0], sizes = [4, 510], strides = [1, 1]} : vector<4x512xf32> to vector<4x510xf32>
    %239 = tpu.concatenate %237, %238 in 1 : vector<4x2xf32>, vector<4x510xf32> -> vector<4x512xf32>
    %c3_99 = arith.constant 3 : index
    %c0_100 = arith.constant 0 : index
    %c0_101 = arith.constant 0 : index
    %240 = vector.load %arg14[%c3_99, %c0_100, %c0_101] : memref<9x1x512xf32, #tpu.memory_space<vmem>>, vector<1x1x512xf32>
    %241 = vector.shape_cast %240 : vector<1x1x512xf32> to vector<1x512xf32>
    %242 = vector.broadcast %241 : vector<1x512xf32> to vector<4x512xf32>
    %243 = arith.mulf %239, %242 : vector<4x512xf32>
    %c12 = arith.constant 12 : index
    %c0_102 = arith.constant 0 : index
    %c0_103 = arith.constant 0 : index
    %244 = vector.load %arg5[%c12, %c0_102, %c0_103] : memref<36x4x1xf32, #tpu.memory_space<vmem>>, vector<1x4x1xf32>
    %245 = vector.shape_cast %244 : vector<1x4x1xf32> to vector<4x1xf32>
    %246 = vector.extract_strided_slice %243 {offsets = [0, 0], sizes = [1, 512], strides = [1, 1]} : vector<4x512xf32> to vector<1x512xf32>
    %247 = vector.broadcast %245 : vector<4x1xf32> to vector<4x512xf32>
    %248 = vector.broadcast %246 : vector<1x512xf32> to vector<4x512xf32>
    %249 = arith.mulf %247, %248 : vector<4x512xf32>
    %250 = arith.addf %236, %249 : vector<4x512xf32>
    %c13 = arith.constant 13 : index
    %c0_104 = arith.constant 0 : index
    %c0_105 = arith.constant 0 : index
    %251 = vector.load %arg5[%c13, %c0_104, %c0_105] : memref<36x4x1xf32, #tpu.memory_space<vmem>>, vector<1x4x1xf32>
    %252 = vector.shape_cast %251 : vector<1x4x1xf32> to vector<4x1xf32>
    %253 = vector.extract_strided_slice %243 {offsets = [1, 0], sizes = [1, 512], strides = [1, 1]} : vector<4x512xf32> to vector<1x512xf32>
    %254 = vector.broadcast %252 : vector<4x1xf32> to vector<4x512xf32>
    %255 = vector.broadcast %253 : vector<1x512xf32> to vector<4x512xf32>
    %256 = arith.mulf %254, %255 : vector<4x512xf32>
    %257 = arith.addf %250, %256 : vector<4x512xf32>
    %c14 = arith.constant 14 : index
    %c0_106 = arith.constant 0 : index
    %c0_107 = arith.constant 0 : index
    %258 = vector.load %arg5[%c14, %c0_106, %c0_107] : memref<36x4x1xf32, #tpu.memory_space<vmem>>, vector<1x4x1xf32>
    %259 = vector.shape_cast %258 : vector<1x4x1xf32> to vector<4x1xf32>
    %260 = vector.extract_strided_slice %243 {offsets = [2, 0], sizes = [1, 512], strides = [1, 1]} : vector<4x512xf32> to vector<1x512xf32>
    %261 = vector.broadcast %259 : vector<4x1xf32> to vector<4x512xf32>
    %262 = vector.broadcast %260 : vector<1x512xf32> to vector<4x512xf32>
    %263 = arith.mulf %261, %262 : vector<4x512xf32>
    %264 = arith.addf %257, %263 : vector<4x512xf32>
    %c15 = arith.constant 15 : index
    %c0_108 = arith.constant 0 : index
    %c0_109 = arith.constant 0 : index
    %265 = vector.load %arg5[%c15, %c0_108, %c0_109] : memref<36x4x1xf32, #tpu.memory_space<vmem>>, vector<1x4x1xf32>
    %266 = vector.shape_cast %265 : vector<1x4x1xf32> to vector<4x1xf32>
    %267 = vector.extract_strided_slice %243 {offsets = [3, 0], sizes = [1, 512], strides = [1, 1]} : vector<4x512xf32> to vector<1x512xf32>
    %268 = vector.broadcast %266 : vector<4x1xf32> to vector<4x512xf32>
    %269 = vector.broadcast %267 : vector<1x512xf32> to vector<4x512xf32>
    %270 = arith.mulf %268, %269 : vector<4x512xf32>
    %271 = arith.addf %264, %270 : vector<4x512xf32>
    %c16 = arith.constant 16 : index
    %c0_110 = arith.constant 0 : index
    %c0_111 = arith.constant 0 : index
    %272 = vector.load %arg5[%c16, %c0_110, %c0_111] : memref<36x4x1xf32, #tpu.memory_space<vmem>>, vector<1x4x1xf32>
    %273 = vector.shape_cast %272 : vector<1x4x1xf32> to vector<4x1xf32>
    %274 = vector.extract_strided_slice %130 {offsets = [0, 0], sizes = [1, 512], strides = [1, 1]} : vector<4x512xf32> to vector<1x512xf32>
    %275 = vector.broadcast %273 : vector<4x1xf32> to vector<4x512xf32>
    %276 = vector.broadcast %274 : vector<1x512xf32> to vector<4x512xf32>
    %277 = arith.mulf %275, %276 : vector<4x512xf32>
    %278 = arith.addf %271, %277 : vector<4x512xf32>
    %c17 = arith.constant 17 : index
    %c0_112 = arith.constant 0 : index
    %c0_113 = arith.constant 0 : index
    %279 = vector.load %arg5[%c17, %c0_112, %c0_113] : memref<36x4x1xf32, #tpu.memory_space<vmem>>, vector<1x4x1xf32>
    %280 = vector.shape_cast %279 : vector<1x4x1xf32> to vector<4x1xf32>
    %281 = vector.extract_strided_slice %130 {offsets = [1, 0], sizes = [1, 512], strides = [1, 1]} : vector<4x512xf32> to vector<1x512xf32>
    %282 = vector.broadcast %280 : vector<4x1xf32> to vector<4x512xf32>
    %283 = vector.broadcast %281 : vector<1x512xf32> to vector<4x512xf32>
    %284 = arith.mulf %282, %283 : vector<4x512xf32>
    %285 = arith.addf %278, %284 : vector<4x512xf32>
    %c18 = arith.constant 18 : index
    %c0_114 = arith.constant 0 : index
    %c0_115 = arith.constant 0 : index
    %286 = vector.load %arg5[%c18, %c0_114, %c0_115] : memref<36x4x1xf32, #tpu.memory_space<vmem>>, vector<1x4x1xf32>
    %287 = vector.shape_cast %286 : vector<1x4x1xf32> to vector<4x1xf32>
    %288 = vector.extract_strided_slice %130 {offsets = [2, 0], sizes = [1, 512], strides = [1, 1]} : vector<4x512xf32> to vector<1x512xf32>
    %289 = vector.broadcast %287 : vector<4x1xf32> to vector<4x512xf32>
    %290 = vector.broadcast %288 : vector<1x512xf32> to vector<4x512xf32>
    %291 = arith.mulf %289, %290 : vector<4x512xf32>
    %292 = arith.addf %285, %291 : vector<4x512xf32>
    %c19 = arith.constant 19 : index
    %c0_116 = arith.constant 0 : index
    %c0_117 = arith.constant 0 : index
    %293 = vector.load %arg5[%c19, %c0_116, %c0_117] : memref<36x4x1xf32, #tpu.memory_space<vmem>>, vector<1x4x1xf32>
    %294 = vector.shape_cast %293 : vector<1x4x1xf32> to vector<4x1xf32>
    %295 = vector.extract_strided_slice %130 {offsets = [3, 0], sizes = [1, 512], strides = [1, 1]} : vector<4x512xf32> to vector<1x512xf32>
    %296 = vector.broadcast %294 : vector<4x1xf32> to vector<4x512xf32>
    %297 = vector.broadcast %295 : vector<1x512xf32> to vector<4x512xf32>
    %298 = arith.mulf %296, %297 : vector<4x512xf32>
    %299 = arith.addf %292, %298 : vector<4x512xf32>
    %300 = vector.extract_strided_slice %130 {offsets = [0, 2], sizes = [4, 510], strides = [1, 1]} : vector<4x512xf32> to vector<4x510xf32>
    %301 = vector.extract_strided_slice %130 {offsets = [0, 0], sizes = [4, 2], strides = [1, 1]} : vector<4x512xf32> to vector<4x2xf32>
    %302 = tpu.concatenate %300, %301 in 1 : vector<4x510xf32>, vector<4x2xf32> -> vector<4x512xf32>
    %c5_118 = arith.constant 5 : index
    %c0_119 = arith.constant 0 : index
    %c0_120 = arith.constant 0 : index
    %303 = vector.load %arg14[%c5_118, %c0_119, %c0_120] : memref<9x1x512xf32, #tpu.memory_space<vmem>>, vector<1x1x512xf32>
    %304 = vector.shape_cast %303 : vector<1x1x512xf32> to vector<1x512xf32>
    %305 = vector.broadcast %304 : vector<1x512xf32> to vector<4x512xf32>
    %306 = arith.mulf %302, %305 : vector<4x512xf32>
    %c20 = arith.constant 20 : index
    %c0_121 = arith.constant 0 : index
    %c0_122 = arith.constant 0 : index
    %307 = vector.load %arg5[%c20, %c0_121, %c0_122] : memref<36x4x1xf32, #tpu.memory_space<vmem>>, vector<1x4x1xf32>
    %308 = vector.shape_cast %307 : vector<1x4x1xf32> to vector<4x1xf32>
    %309 = vector.extract_strided_slice %306 {offsets = [0, 0], sizes = [1, 512], strides = [1, 1]} : vector<4x512xf32> to vector<1x512xf32>
    %310 = vector.broadcast %308 : vector<4x1xf32> to vector<4x512xf32>
    %311 = vector.broadcast %309 : vector<1x512xf32> to vector<4x512xf32>
    %312 = arith.mulf %310, %311 : vector<4x512xf32>
    %313 = arith.addf %299, %312 : vector<4x512xf32>
    %c21 = arith.constant 21 : index
    %c0_123 = arith.constant 0 : index
    %c0_124 = arith.constant 0 : index
    %314 = vector.load %arg5[%c21, %c0_123, %c0_124] : memref<36x4x1xf32, #tpu.memory_space<vmem>>, vector<1x4x1xf32>
    %315 = vector.shape_cast %314 : vector<1x4x1xf32> to vector<4x1xf32>
    %316 = vector.extract_strided_slice %306 {offsets = [1, 0], sizes = [1, 512], strides = [1, 1]} : vector<4x512xf32> to vector<1x512xf32>
    %317 = vector.broadcast %315 : vector<4x1xf32> to vector<4x512xf32>
    %318 = vector.broadcast %316 : vector<1x512xf32> to vector<4x512xf32>
    %319 = arith.mulf %317, %318 : vector<4x512xf32>
    %320 = arith.addf %313, %319 : vector<4x512xf32>
    %c22 = arith.constant 22 : index
    %c0_125 = arith.constant 0 : index
    %c0_126 = arith.constant 0 : index
    %321 = vector.load %arg5[%c22, %c0_125, %c0_126] : memref<36x4x1xf32, #tpu.memory_space<vmem>>, vector<1x4x1xf32>
    %322 = vector.shape_cast %321 : vector<1x4x1xf32> to vector<4x1xf32>
    %323 = vector.extract_strided_slice %306 {offsets = [2, 0], sizes = [1, 512], strides = [1, 1]} : vector<4x512xf32> to vector<1x512xf32>
    %324 = vector.broadcast %322 : vector<4x1xf32> to vector<4x512xf32>
    %325 = vector.broadcast %323 : vector<1x512xf32> to vector<4x512xf32>
    %326 = arith.mulf %324, %325 : vector<4x512xf32>
    %327 = arith.addf %320, %326 : vector<4x512xf32>
    %c23 = arith.constant 23 : index
    %c0_127 = arith.constant 0 : index
    %c0_128 = arith.constant 0 : index
    %328 = vector.load %arg5[%c23, %c0_127, %c0_128] : memref<36x4x1xf32, #tpu.memory_space<vmem>>, vector<1x4x1xf32>
    %329 = vector.shape_cast %328 : vector<1x4x1xf32> to vector<4x1xf32>
    %330 = vector.extract_strided_slice %306 {offsets = [3, 0], sizes = [1, 512], strides = [1, 1]} : vector<4x512xf32> to vector<1x512xf32>
    %331 = vector.broadcast %329 : vector<4x1xf32> to vector<4x512xf32>
    %332 = vector.broadcast %330 : vector<1x512xf32> to vector<4x512xf32>
    %333 = arith.mulf %331, %332 : vector<4x512xf32>
    %334 = arith.addf %327, %333 : vector<4x512xf32>
    %335 = vector.extract_strided_slice %130 {offsets = [0, 30], sizes = [4, 482], strides = [1, 1]} : vector<4x512xf32> to vector<4x482xf32>
    %336 = vector.extract_strided_slice %130 {offsets = [0, 0], sizes = [4, 30], strides = [1, 1]} : vector<4x512xf32> to vector<4x30xf32>
    %337 = tpu.concatenate %335, %336 in 1 : vector<4x482xf32>, vector<4x30xf32> -> vector<4x512xf32>
    %c6_129 = arith.constant 6 : index
    %c0_130 = arith.constant 0 : index
    %c0_131 = arith.constant 0 : index
    %338 = vector.load %arg14[%c6_129, %c0_130, %c0_131] : memref<9x1x512xf32, #tpu.memory_space<vmem>>, vector<1x1x512xf32>
    %339 = vector.shape_cast %338 : vector<1x1x512xf32> to vector<1x512xf32>
    %340 = vector.broadcast %339 : vector<1x512xf32> to vector<4x512xf32>
    %341 = arith.mulf %337, %340 : vector<4x512xf32>
    %c24 = arith.constant 24 : index
    %c0_132 = arith.constant 0 : index
    %c0_133 = arith.constant 0 : index
    %342 = vector.load %arg5[%c24, %c0_132, %c0_133] : memref<36x4x1xf32, #tpu.memory_space<vmem>>, vector<1x4x1xf32>
    %343 = vector.shape_cast %342 : vector<1x4x1xf32> to vector<4x1xf32>
    %344 = vector.extract_strided_slice %341 {offsets = [0, 0], sizes = [1, 512], strides = [1, 1]} : vector<4x512xf32> to vector<1x512xf32>
    %345 = vector.broadcast %343 : vector<4x1xf32> to vector<4x512xf32>
    %346 = vector.broadcast %344 : vector<1x512xf32> to vector<4x512xf32>
    %347 = arith.mulf %345, %346 : vector<4x512xf32>
    %348 = arith.addf %334, %347 : vector<4x512xf32>
    %c25 = arith.constant 25 : index
    %c0_134 = arith.constant 0 : index
    %c0_135 = arith.constant 0 : index
    %349 = vector.load %arg5[%c25, %c0_134, %c0_135] : memref<36x4x1xf32, #tpu.memory_space<vmem>>, vector<1x4x1xf32>
    %350 = vector.shape_cast %349 : vector<1x4x1xf32> to vector<4x1xf32>
    %351 = vector.extract_strided_slice %341 {offsets = [1, 0], sizes = [1, 512], strides = [1, 1]} : vector<4x512xf32> to vector<1x512xf32>
    %352 = vector.broadcast %350 : vector<4x1xf32> to vector<4x512xf32>
    %353 = vector.broadcast %351 : vector<1x512xf32> to vector<4x512xf32>
    %354 = arith.mulf %352, %353 : vector<4x512xf32>
    %355 = arith.addf %348, %354 : vector<4x512xf32>
    %c26 = arith.constant 26 : index
    %c0_136 = arith.constant 0 : index
    %c0_137 = arith.constant 0 : index
    %356 = vector.load %arg5[%c26, %c0_136, %c0_137] : memref<36x4x1xf32, #tpu.memory_space<vmem>>, vector<1x4x1xf32>
    %357 = vector.shape_cast %356 : vector<1x4x1xf32> to vector<4x1xf32>
    %358 = vector.extract_strided_slice %341 {offsets = [2, 0], sizes = [1, 512], strides = [1, 1]} : vector<4x512xf32> to vector<1x512xf32>
    %359 = vector.broadcast %357 : vector<4x1xf32> to vector<4x512xf32>
    %360 = vector.broadcast %358 : vector<1x512xf32> to vector<4x512xf32>
    %361 = arith.mulf %359, %360 : vector<4x512xf32>
    %362 = arith.addf %355, %361 : vector<4x512xf32>
    %c27 = arith.constant 27 : index
    %c0_138 = arith.constant 0 : index
    %c0_139 = arith.constant 0 : index
    %363 = vector.load %arg5[%c27, %c0_138, %c0_139] : memref<36x4x1xf32, #tpu.memory_space<vmem>>, vector<1x4x1xf32>
    %364 = vector.shape_cast %363 : vector<1x4x1xf32> to vector<4x1xf32>
    %365 = vector.extract_strided_slice %341 {offsets = [3, 0], sizes = [1, 512], strides = [1, 1]} : vector<4x512xf32> to vector<1x512xf32>
    %366 = vector.broadcast %364 : vector<4x1xf32> to vector<4x512xf32>
    %367 = vector.broadcast %365 : vector<1x512xf32> to vector<4x512xf32>
    %368 = arith.mulf %366, %367 : vector<4x512xf32>
    %369 = arith.addf %362, %368 : vector<4x512xf32>
    %370 = vector.extract_strided_slice %130 {offsets = [0, 32], sizes = [4, 480], strides = [1, 1]} : vector<4x512xf32> to vector<4x480xf32>
    %371 = vector.extract_strided_slice %130 {offsets = [0, 0], sizes = [4, 32], strides = [1, 1]} : vector<4x512xf32> to vector<4x32xf32>
    %372 = tpu.concatenate %370, %371 in 1 : vector<4x480xf32>, vector<4x32xf32> -> vector<4x512xf32>
    %c7_140 = arith.constant 7 : index
    %c0_141 = arith.constant 0 : index
    %c0_142 = arith.constant 0 : index
    %373 = vector.load %arg14[%c7_140, %c0_141, %c0_142] : memref<9x1x512xf32, #tpu.memory_space<vmem>>, vector<1x1x512xf32>
    %374 = vector.shape_cast %373 : vector<1x1x512xf32> to vector<1x512xf32>
    %375 = vector.broadcast %374 : vector<1x512xf32> to vector<4x512xf32>
    %376 = arith.mulf %372, %375 : vector<4x512xf32>
    %c28 = arith.constant 28 : index
    %c0_143 = arith.constant 0 : index
    %c0_144 = arith.constant 0 : index
    %377 = vector.load %arg5[%c28, %c0_143, %c0_144] : memref<36x4x1xf32, #tpu.memory_space<vmem>>, vector<1x4x1xf32>
    %378 = vector.shape_cast %377 : vector<1x4x1xf32> to vector<4x1xf32>
    %379 = vector.extract_strided_slice %376 {offsets = [0, 0], sizes = [1, 512], strides = [1, 1]} : vector<4x512xf32> to vector<1x512xf32>
    %380 = vector.broadcast %378 : vector<4x1xf32> to vector<4x512xf32>
    %381 = vector.broadcast %379 : vector<1x512xf32> to vector<4x512xf32>
    %382 = arith.mulf %380, %381 : vector<4x512xf32>
    %383 = arith.addf %369, %382 : vector<4x512xf32>
    %c29 = arith.constant 29 : index
    %c0_145 = arith.constant 0 : index
    %c0_146 = arith.constant 0 : index
    %384 = vector.load %arg5[%c29, %c0_145, %c0_146] : memref<36x4x1xf32, #tpu.memory_space<vmem>>, vector<1x4x1xf32>
    %385 = vector.shape_cast %384 : vector<1x4x1xf32> to vector<4x1xf32>
    %386 = vector.extract_strided_slice %376 {offsets = [1, 0], sizes = [1, 512], strides = [1, 1]} : vector<4x512xf32> to vector<1x512xf32>
    %387 = vector.broadcast %385 : vector<4x1xf32> to vector<4x512xf32>
    %388 = vector.broadcast %386 : vector<1x512xf32> to vector<4x512xf32>
    %389 = arith.mulf %387, %388 : vector<4x512xf32>
    %390 = arith.addf %383, %389 : vector<4x512xf32>
    %c30 = arith.constant 30 : index
    %c0_147 = arith.constant 0 : index
    %c0_148 = arith.constant 0 : index
    %391 = vector.load %arg5[%c30, %c0_147, %c0_148] : memref<36x4x1xf32, #tpu.memory_space<vmem>>, vector<1x4x1xf32>
    %392 = vector.shape_cast %391 : vector<1x4x1xf32> to vector<4x1xf32>
    %393 = vector.extract_strided_slice %376 {offsets = [2, 0], sizes = [1, 512], strides = [1, 1]} : vector<4x512xf32> to vector<1x512xf32>
    %394 = vector.broadcast %392 : vector<4x1xf32> to vector<4x512xf32>
    %395 = vector.broadcast %393 : vector<1x512xf32> to vector<4x512xf32>
    %396 = arith.mulf %394, %395 : vector<4x512xf32>
    %397 = arith.addf %390, %396 : vector<4x512xf32>
    %c31 = arith.constant 31 : index
    %c0_149 = arith.constant 0 : index
    %c0_150 = arith.constant 0 : index
    %398 = vector.load %arg5[%c31, %c0_149, %c0_150] : memref<36x4x1xf32, #tpu.memory_space<vmem>>, vector<1x4x1xf32>
    %399 = vector.shape_cast %398 : vector<1x4x1xf32> to vector<4x1xf32>
    %400 = vector.extract_strided_slice %376 {offsets = [3, 0], sizes = [1, 512], strides = [1, 1]} : vector<4x512xf32> to vector<1x512xf32>
    %401 = vector.broadcast %399 : vector<4x1xf32> to vector<4x512xf32>
    %402 = vector.broadcast %400 : vector<1x512xf32> to vector<4x512xf32>
    %403 = arith.mulf %401, %402 : vector<4x512xf32>
    %404 = arith.addf %397, %403 : vector<4x512xf32>
    %405 = vector.extract_strided_slice %130 {offsets = [0, 34], sizes = [4, 478], strides = [1, 1]} : vector<4x512xf32> to vector<4x478xf32>
    %406 = vector.extract_strided_slice %130 {offsets = [0, 0], sizes = [4, 34], strides = [1, 1]} : vector<4x512xf32> to vector<4x34xf32>
    %407 = tpu.concatenate %405, %406 in 1 : vector<4x478xf32>, vector<4x34xf32> -> vector<4x512xf32>
    %c8_151 = arith.constant 8 : index
    %c0_152 = arith.constant 0 : index
    %c0_153 = arith.constant 0 : index
    %408 = vector.load %arg14[%c8_151, %c0_152, %c0_153] : memref<9x1x512xf32, #tpu.memory_space<vmem>>, vector<1x1x512xf32>
    %409 = vector.shape_cast %408 : vector<1x1x512xf32> to vector<1x512xf32>
    %410 = vector.broadcast %409 : vector<1x512xf32> to vector<4x512xf32>
    %411 = arith.mulf %407, %410 : vector<4x512xf32>
    %c32 = arith.constant 32 : index
    %c0_154 = arith.constant 0 : index
    %c0_155 = arith.constant 0 : index
    %412 = vector.load %arg5[%c32, %c0_154, %c0_155] : memref<36x4x1xf32, #tpu.memory_space<vmem>>, vector<1x4x1xf32>
    %413 = vector.shape_cast %412 : vector<1x4x1xf32> to vector<4x1xf32>
    %414 = vector.extract_strided_slice %411 {offsets = [0, 0], sizes = [1, 512], strides = [1, 1]} : vector<4x512xf32> to vector<1x512xf32>
    %415 = vector.broadcast %413 : vector<4x1xf32> to vector<4x512xf32>
    %416 = vector.broadcast %414 : vector<1x512xf32> to vector<4x512xf32>
    %417 = arith.mulf %415, %416 : vector<4x512xf32>
    %418 = arith.addf %404, %417 : vector<4x512xf32>
    %c33 = arith.constant 33 : index
    %c0_156 = arith.constant 0 : index
    %c0_157 = arith.constant 0 : index
    %419 = vector.load %arg5[%c33, %c0_156, %c0_157] : memref<36x4x1xf32, #tpu.memory_space<vmem>>, vector<1x4x1xf32>
    %420 = vector.shape_cast %419 : vector<1x4x1xf32> to vector<4x1xf32>
    %421 = vector.extract_strided_slice %411 {offsets = [1, 0], sizes = [1, 512], strides = [1, 1]} : vector<4x512xf32> to vector<1x512xf32>
    %422 = vector.broadcast %420 : vector<4x1xf32> to vector<4x512xf32>
    %423 = vector.broadcast %421 : vector<1x512xf32> to vector<4x512xf32>
    %424 = arith.mulf %422, %423 : vector<4x512xf32>
    %425 = arith.addf %418, %424 : vector<4x512xf32>
    %c34 = arith.constant 34 : index
    %c0_158 = arith.constant 0 : index
    %c0_159 = arith.constant 0 : index
    %426 = vector.load %arg5[%c34, %c0_158, %c0_159] : memref<36x4x1xf32, #tpu.memory_space<vmem>>, vector<1x4x1xf32>
    %427 = vector.shape_cast %426 : vector<1x4x1xf32> to vector<4x1xf32>
    %428 = vector.extract_strided_slice %411 {offsets = [2, 0], sizes = [1, 512], strides = [1, 1]} : vector<4x512xf32> to vector<1x512xf32>
    %429 = vector.broadcast %427 : vector<4x1xf32> to vector<4x512xf32>
    %430 = vector.broadcast %428 : vector<1x512xf32> to vector<4x512xf32>
    %431 = arith.mulf %429, %430 : vector<4x512xf32>
    %432 = arith.addf %425, %431 : vector<4x512xf32>
    %c35 = arith.constant 35 : index
    %c0_160 = arith.constant 0 : index
    %c0_161 = arith.constant 0 : index
    %433 = vector.load %arg5[%c35, %c0_160, %c0_161] : memref<36x4x1xf32, #tpu.memory_space<vmem>>, vector<1x4x1xf32>
    %434 = vector.shape_cast %433 : vector<1x4x1xf32> to vector<4x1xf32>
    %435 = vector.extract_strided_slice %411 {offsets = [3, 0], sizes = [1, 512], strides = [1, 1]} : vector<4x512xf32> to vector<1x512xf32>
    %436 = vector.broadcast %434 : vector<4x1xf32> to vector<4x512xf32>
    %437 = vector.broadcast %435 : vector<1x512xf32> to vector<4x512xf32>
    %438 = arith.mulf %436, %437 : vector<4x512xf32>
    %439 = arith.addf %432, %438 : vector<4x512xf32>
    %c0_162 = arith.constant 0 : index
    %c0_163 = arith.constant 0 : index
    %440 = vector.load %arg6[%c0_162, %c0_163] : memref<4x1xf32, #tpu.memory_space<vmem>>, vector<4x1xf32>
    %441 = vector.broadcast %440 : vector<4x1xf32> to vector<4x512xf32>
    %442 = arith.addf %439, %441 : vector<4x512xf32>
    %c0_164 = arith.constant 0 : index
    %c0_165 = arith.constant 0 : index
    %443 = vector.load %arg7[%c0_164, %c0_165] : memref<4x1xf32, #tpu.memory_space<vmem>>, vector<4x1xf32>
    %c0_166 = arith.constant 0 : index
    %c0_167 = arith.constant 0 : index
    %444 = vector.load %arg8[%c0_166, %c0_167] : memref<4x1xf32, #tpu.memory_space<vmem>>, vector<4x1xf32>
    %cst_168 = arith.constant dense<0.000000e+00> : vector<4xf32>
    %445 = vector.multi_reduction <add>, %442, %cst_168 [1] : vector<4x512xf32> to vector<4xf32>
    %446 = vector.shape_cast %445 : vector<4xf32> to vector<4x1xf32>
    %cst_169 = arith.constant 5.120000e+02 : f32
    %447 = vector.broadcast %cst_169 : f32 to vector<4x1xf32>
    %448 = arith.divf %446, %447 : vector<4x1xf32>
    %449 = vector.broadcast %448 : vector<4x1xf32> to vector<4x512xf32>
    %450 = arith.subf %442, %449 : vector<4x512xf32>
    %451 = arith.mulf %450, %450 : vector<4x512xf32>
    %cst_170 = arith.constant dense<0.000000e+00> : vector<4xf32>
    %452 = vector.multi_reduction <add>, %451, %cst_170 [1] : vector<4x512xf32> to vector<4xf32>
    %453 = vector.shape_cast %452 : vector<4xf32> to vector<4x1xf32>
    %cst_171 = arith.constant 5.120000e+02 : f32
    %454 = vector.broadcast %cst_171 : f32 to vector<4x1xf32>
    %455 = arith.divf %453, %454 : vector<4x1xf32>
    %456 = vector.broadcast %448 : vector<4x1xf32> to vector<4x512xf32>
    %457 = arith.subf %442, %456 : vector<4x512xf32>
    %cst_172 = arith.constant 9.99999974E-6 : f32
    %458 = vector.broadcast %cst_172 : f32 to vector<4x1xf32>
    %459 = arith.addf %455, %458 : vector<4x1xf32>
    %460 = math.rsqrt %459 : vector<4x1xf32>
    %461 = arith.mulf %443, %460 : vector<4x1xf32>
    %462 = vector.broadcast %461 : vector<4x1xf32> to vector<4x512xf32>
    %463 = arith.mulf %457, %462 : vector<4x512xf32>
    %464 = vector.broadcast %444 : vector<4x1xf32> to vector<4x512xf32>
    %465 = arith.addf %463, %464 : vector<4x512xf32>
    %cst_173 = arith.constant 0.000000e+00 : f32
    %466 = vector.broadcast %cst_173 : f32 to vector<4x512xf32>
    %467 = arith.maximumf %465, %466 : vector<4x512xf32>
    %cst_174 = arith.constant 0.000000e+00 : f32
    %468 = vector.broadcast %cst_174 : f32 to vector<4x512xf32>
    %c0_175 = arith.constant 0 : index
    %c0_176 = arith.constant 0 : index
    %c0_177 = arith.constant 0 : index
    %469 = vector.load %arg9[%c0_175, %c0_176, %c0_177] : memref<4x4x1xf32, #tpu.memory_space<vmem>>, vector<1x4x1xf32>
    %470 = vector.shape_cast %469 : vector<1x4x1xf32> to vector<4x1xf32>
    %471 = vector.extract_strided_slice %467 {offsets = [0, 0], sizes = [1, 512], strides = [1, 1]} : vector<4x512xf32> to vector<1x512xf32>
    %472 = vector.broadcast %470 : vector<4x1xf32> to vector<4x512xf32>
    %473 = vector.broadcast %471 : vector<1x512xf32> to vector<4x512xf32>
    %474 = arith.mulf %472, %473 : vector<4x512xf32>
    %475 = arith.addf %468, %474 : vector<4x512xf32>
    %c1_178 = arith.constant 1 : index
    %c0_179 = arith.constant 0 : index
    %c0_180 = arith.constant 0 : index
    %476 = vector.load %arg9[%c1_178, %c0_179, %c0_180] : memref<4x4x1xf32, #tpu.memory_space<vmem>>, vector<1x4x1xf32>
    %477 = vector.shape_cast %476 : vector<1x4x1xf32> to vector<4x1xf32>
    %478 = vector.extract_strided_slice %467 {offsets = [1, 0], sizes = [1, 512], strides = [1, 1]} : vector<4x512xf32> to vector<1x512xf32>
    %479 = vector.broadcast %477 : vector<4x1xf32> to vector<4x512xf32>
    %480 = vector.broadcast %478 : vector<1x512xf32> to vector<4x512xf32>
    %481 = arith.mulf %479, %480 : vector<4x512xf32>
    %482 = arith.addf %475, %481 : vector<4x512xf32>
    %c2_181 = arith.constant 2 : index
    %c0_182 = arith.constant 0 : index
    %c0_183 = arith.constant 0 : index
    %483 = vector.load %arg9[%c2_181, %c0_182, %c0_183] : memref<4x4x1xf32, #tpu.memory_space<vmem>>, vector<1x4x1xf32>
    %484 = vector.shape_cast %483 : vector<1x4x1xf32> to vector<4x1xf32>
    %485 = vector.extract_strided_slice %467 {offsets = [2, 0], sizes = [1, 512], strides = [1, 1]} : vector<4x512xf32> to vector<1x512xf32>
    %486 = vector.broadcast %484 : vector<4x1xf32> to vector<4x512xf32>
    %487 = vector.broadcast %485 : vector<1x512xf32> to vector<4x512xf32>
    %488 = arith.mulf %486, %487 : vector<4x512xf32>
    %489 = arith.addf %482, %488 : vector<4x512xf32>
    %c3_184 = arith.constant 3 : index
    %c0_185 = arith.constant 0 : index
    %c0_186 = arith.constant 0 : index
    %490 = vector.load %arg9[%c3_184, %c0_185, %c0_186] : memref<4x4x1xf32, #tpu.memory_space<vmem>>, vector<1x4x1xf32>
    %491 = vector.shape_cast %490 : vector<1x4x1xf32> to vector<4x1xf32>
    %492 = vector.extract_strided_slice %467 {offsets = [3, 0], sizes = [1, 512], strides = [1, 1]} : vector<4x512xf32> to vector<1x512xf32>
    %493 = vector.broadcast %491 : vector<4x1xf32> to vector<4x512xf32>
    %494 = vector.broadcast %492 : vector<1x512xf32> to vector<4x512xf32>
    %495 = arith.mulf %493, %494 : vector<4x512xf32>
    %496 = arith.addf %489, %495 : vector<4x512xf32>
    %c0_187 = arith.constant 0 : index
    %c0_188 = arith.constant 0 : index
    %497 = vector.load %arg10[%c0_187, %c0_188] : memref<4x1xf32, #tpu.memory_space<vmem>>, vector<4x1xf32>
    %498 = vector.broadcast %497 : vector<4x1xf32> to vector<4x512xf32>
    %499 = arith.addf %496, %498 : vector<4x512xf32>
    %c0_189 = arith.constant 0 : index
    %c0_190 = arith.constant 0 : index
    %500 = vector.load %arg11[%c0_189, %c0_190] : memref<4x1xf32, #tpu.memory_space<vmem>>, vector<4x1xf32>
    %c0_191 = arith.constant 0 : index
    %c0_192 = arith.constant 0 : index
    %501 = vector.load %arg12[%c0_191, %c0_192] : memref<4x1xf32, #tpu.memory_space<vmem>>, vector<4x1xf32>
    %cst_193 = arith.constant dense<0.000000e+00> : vector<4xf32>
    %502 = vector.multi_reduction <add>, %499, %cst_193 [1] : vector<4x512xf32> to vector<4xf32>
    %503 = vector.shape_cast %502 : vector<4xf32> to vector<4x1xf32>
    %cst_194 = arith.constant 5.120000e+02 : f32
    %504 = vector.broadcast %cst_194 : f32 to vector<4x1xf32>
    %505 = arith.divf %503, %504 : vector<4x1xf32>
    %506 = vector.broadcast %505 : vector<4x1xf32> to vector<4x512xf32>
    %507 = arith.subf %499, %506 : vector<4x512xf32>
    %508 = arith.mulf %507, %507 : vector<4x512xf32>
    %cst_195 = arith.constant dense<0.000000e+00> : vector<4xf32>
    %509 = vector.multi_reduction <add>, %508, %cst_195 [1] : vector<4x512xf32> to vector<4xf32>
    %510 = vector.shape_cast %509 : vector<4xf32> to vector<4x1xf32>
    %cst_196 = arith.constant 5.120000e+02 : f32
    %511 = vector.broadcast %cst_196 : f32 to vector<4x1xf32>
    %512 = arith.divf %510, %511 : vector<4x1xf32>
    %513 = vector.broadcast %505 : vector<4x1xf32> to vector<4x512xf32>
    %514 = arith.subf %499, %513 : vector<4x512xf32>
    %cst_197 = arith.constant 9.99999974E-6 : f32
    %515 = vector.broadcast %cst_197 : f32 to vector<4x1xf32>
    %516 = arith.addf %512, %515 : vector<4x1xf32>
    %517 = math.rsqrt %516 : vector<4x1xf32>
    %518 = arith.mulf %500, %517 : vector<4x1xf32>
    %519 = vector.broadcast %518 : vector<4x1xf32> to vector<4x512xf32>
    %520 = arith.mulf %514, %519 : vector<4x512xf32>
    %521 = vector.broadcast %501 : vector<4x1xf32> to vector<4x512xf32>
    %522 = arith.addf %520, %521 : vector<4x512xf32>
    %c0_198 = arith.constant 0 : index
    %c0_199 = arith.constant 0 : index
    %523 = vector.load %arg15[%c0_198, %c0_199] : memref<4x512xf32, #tpu.memory_space<vmem>>, vector<4x512xf32>
    tpu.vector_store %arg15[%c0_198, %c0_199], %522 {strides = array<i32>} : memref<4x512xf32, #tpu.memory_space<vmem>>, vector<4x512xf32>,
    return
  }
}

</mosaic_0001>

<bundles_post_ra>
// kernel: tpu_custom_call.1
= control target key start
LH: loop header
LB: loop body
LE: loop exit
PB: predicated region body
PF: predicated region fallthrough
CT: control target
= control target key end

     0   :  { %v2482_v3 = vmov 0   ;;  %s2483_s28 = smov 17   ;;  %s3952_s0 = inlined_call_operand.vmem [shape: f32[4,512], index: 0, kind: input, shape index: {}]   ;;  %s3953_s1 = inlined_call_operand.vmem [shape: f32[9,4,1], index: 1, kind: input, shape index: {}]   ;;  %s3954_s2 = inlined_call_operand.vmem [shape: f32[4,1], index: 2, kind: input, shape index: {}]   ;;  %s3955_s3 = inlined_call_operand.vmem [shape: f32[4,1], index: 3, kind: input, shape index: {}]   ;;  %s3956_s4 = inlined_call_operand.vmem [shape: f32[4,1], index: 4, kind: input, shape index: {}]   ;;  %s3957_s5 = inlined_call_operand.vmem [shape: f32[36,4,1], index: 5, kind: input, shape index: {}]   ;;  %s3958_s6 = inlined_call_operand.vmem [shape: f32[4,1], index: 6, kind: input, shape index: {}]   ;;  %s3959_s7 = inlined_call_operand.vmem [shape: f32[4,1], index: 7, kind: input, shape index: {}]   ;;  %s3960_s8 = inlined_call_operand.vmem [shape: f32[4,1], index: 8, kind: input, shape index: {}]   ;;  %s3961_s9 = inlined_call_operand.vmem [shape: f32[4,4,1], index: 9, kind: input, shape index: {}]   ;;  %s3962_s10 = inlined_call_operand.vmem [shape: f32[4,1], index: 10, kind: input, shape index: {}]   ;;  %s3963_s11 = inlined_call_operand.vmem [shape: f32[4,1], index: 11, kind: input, shape index: {}]   ;;  %s3964_s12 = inlined_call_operand.vmem [shape: f32[4,1], index: 12, kind: input, shape index: {}]   ;;  %s3965_s13 = inlined_call_operand.vmem [shape: f32[9,1,512], index: 13, kind: input, shape index: {}]   ;;  %s3966_s14 = inlined_call_operand.vmem [shape: f32[9,1,512], index: 14, kind: input, shape index: {}]   ;;  %s3967_s15 = inlined_call_operand.hbm [shape: f32[4,512], index: 15, kind: output, shape index: {}]  }
   0x1   :  { %v2373_v0 = vld [vmem:[%s3953_s1 + $0x8] sm:$0xf]  ;;  %v101_v1 = vld [vmem:[%s3953_s1] sm:$0xf]  ;;  %2449 = vset.pattern.permute.xlu1 %v2482_v3  ;;  %2448 = vset.pattern.permute.xlu0 %v2482_v3  ;;  %v2371_v5 = vld [vmem:[%s3953_s1 + $0x4] sm:$0xf] }
   0x2   :  { %v2589_v2 = vld [vmem:[%s3952_s0 + $0x8] sm:$0xff]  ;;  %224 = vperm.xlu1 %2449, %v2373_v0   ;;  %104 = vperm.xlu0 %2448, %v101_v1   ;;  %v2601_v6 = vld [vmem:[%s3952_s0] sm:$0xff] }
   0x3   :  { %v2593_v4 = vcombine.high %v2589_v2, %v2589_v2  ;;  %v2606_v7 = vcombine.high %v2601_v6, %v2601_v6 }
   0x6   :  { %164 = vperm.xlu0 %2448, %v2371_v5   ;;  %55 = vrot.lane.b32.xlu1 %v2593_v4, %s2483_s28 }
   0x7   :  { %20 = vsyncpa [#allocation3], 0  ;;  %s2484_s29 = smov 16   ;;  %v2375_v8 = vld [vmem:[%s3953_s1 + $0xc] sm:$0xf]  ;;  %s2485_s16 = smov 15   ;;  %v77_v31 = vlaneseq }
   0x8   :  { %v2376_v9 = vld [vmem:[%s3953_s1 + $0x10] sm:$0xf]  ;;  %s2486_s19 = smov 1   ;;  %v2378_v10 = vld [vmem:[%s3953_s1 + $0x14] sm:$0xf]  ;;  %s2487_s24 = smov 127  }
   0x9   :  { %v2380_v11 = vld [vmem:[%s3953_s1 + $0x18] sm:$0xf]  ;;  %v2382_v12 = vld [vmem:[%s3953_s1 + $0x1c] sm:$0xf]  ;;  %s2488_s27 = smov 113   ;;  %s2489_s0 = smov 112  }
   0xa   :  { %60 = vrot.lane.b32.xlu0 %v2601_v6, %s2483_s28  ;;  %62 = vrot.lane.b32.xlu1 %v2606_v7, %s2483_s28  ;;  %v2384_v13 = vld [vmem:[%s3953_s1 + $0x20] sm:$0xf]  ;;  %s2490_s30 = smov 111   ;;  %v78_v34 = vshrl.u32 %v77_v31, 7  ;;  %v2708_v40 = vld [vmem:[%s3965_s13 + $0x4] sm:$0xf] }
   0xb   :  { %v552_v14 = vld [vmem:[%s3954_s2] sm:$0xf]  ;;  %vm66_vm0 = vcmask 138240   ;;  %v2723_v46 = vld [vmem:[%s3965_s13 + $0x8] sm:$0xf]  ;;  %vm124_vm1 = vcmask 130048  }
   0xc   :  { %v2696_v37 = vsub.s32 0, %v78_v34  ;;  %v2701_v38 = vld [vmem:[%s3965_s13] sm:$0xf]  ;;  %v2703_v39 = vsub.s32 1, %v78_v34  ;;  %v2710_v41 = vsub.s32 2, %v78_v34  ;;  %v2712_v42 = vsub.s32 3, %v78_v34 }
   0xd   :  { %v2734_v50 = vld [vmem:[%s3965_s13 + $0xc] sm:$0xf]  ;;  %v2751_v57 = vld [vmem:[%s3965_s13 + $0x14] sm:$0xf]  ;;  %vm184_vm2 = vcmask 121856   ;;  %vm244_vm3 = vcmask 7168  }
   0xe   :  { %115 = vrot.lane.b32.xlu0 %v2593_v4, %s2484_s29  ;;  %118 = vrot.lane.b32.xlu1 %v2601_v6, %s2484_s29  ;;  %v80_v45 = vrot.slane %v2701_v38, %v2696_v37  ;;  %v84_v47 = vrot.slane %v2701_v38, %v2703_v39  ;;  %v139_v48 = vrot.slane %v2708_v40, %v2696_v37  ;;  %v2762_v61 = vld [vmem:[%s3965_s13 + $0x18] sm:$0xf]  ;;  %v2824_v31 = vld [vmem:[%s3965_s13 + $0x20] sm:$0xf]  ;;  %vm320_vm4 = vcmask 1039360   ;;  %s2492_s23 = smov 32  }
   0xf   :  { %v143_v49 = vrot.slane %v2708_v40, %v2703_v39  ;;  %v88_v51 = vrot.slane %v2701_v38, %v2710_v41  ;;  %v92_v52 = vrot.slane %v2701_v38, %v2712_v42  ;;  %v147_v53 = vrot.slane %v2708_v40, %v2710_v41  ;;  %s2493_s26 = smov 30   ;;  %s2497_s25 = smov 96  }
  0x10   :  { %v151_v54 = vrot.slane %v2708_v40, %v2712_v42  ;;  %v199_v58 = vrot.slane %v2723_v46, %v2696_v37  ;;  %v203_v59 = vrot.slane %v2723_v46, %v2703_v39  ;;  %v207_v60 = vrot.slane %v2723_v46, %v2710_v41  ;;  %s2499_s20 = smov [#allocation2]  }
  0x11   :  { %v211_v62 = vrot.slane %v2723_v46, %v2712_v42  ;;  %v259_v63 = vrot.slane %v2734_v50, %v2696_v37  ;;  %v263_v0 = vrot.slane %v2734_v50, %v2703_v39  ;;  %v267_v1 = vrot.slane %v2734_v50, %v2710_v41 }
  0x12   :  { %120 = vrot.lane.b32.xlu0 %v2606_v7, %s2484_s29  ;;  %284 = vperm.xlu1 %2449, %v2375_v8   ;;  %vm380_vm5 = vcmask 924672   ;;  %vm440_vm6 = vcmask 916480   ;;  %vm500_vm7 = vcmask 908288   ;;  %vm564_vm8 = vcmask 1043456  }
  0x13   :  { %vm632_vm9 = vcmask 277504   ;;  %vm799_vm10 = vcmask 261120   ;;  %vm968_vm11 = vcmask 244736   ;;  %vm1137_vm12 = vcmask 15360  }
  0x14   :  { %vm1429_vm13 = vcmask 1031168   ;;  %vm1598_vm14 = vcmask 801792   ;;  %vm1767_vm15 = vcmask 785408  }
  0x16   :  { %64 = vrot.lane.b32.xlu0 %v2589_v2, %s2483_s28  ;;  %122 = vrot.lane.b32.xlu1 %v2589_v2, %s2484_s29  ;;  %s2494_s29 = smov 2   ;;  %s2498_s28 = smov 94  }
  0x1a   :  { %175 = vrot.lane.b32.xlu0 %v2593_v4, %s2485_s16  ;;  %178 = vrot.lane.b32.xlu1 %v2601_v6, %s2485_s16 }
  0x1e   :  { %180 = vrot.lane.b32.xlu0 %v2606_v7, %s2485_s16  ;;  %299 = vperm.xlu1 %2449, %v2376_v9   ;;  %v2781_v9 = vld [vmem:[%s3965_s13 + $0x1c] sm:$0xf] }
  0x22   :  { %182 = vrot.lane.b32.xlu0 %v2589_v2, %s2485_s16  ;;  %235 = vrot.lane.b32.xlu1 %v2593_v4, %s2486_s19 }
  0x26   :  { %238 = vrot.lane.b32.xlu0 %v2601_v6, %s2486_s19  ;;  %240 = vrot.lane.b32.xlu1 %v2606_v7, %s2486_s19 }
  0x2a   :  { %361 = vperm.xlu0 %2448, %v2378_v10   ;;  %242 = vrot.lane.b32.xlu1 %v2589_v2, %s2486_s19  ;;  %s2495_s19 = smov 126  }
  0x2e   :  { %421 = vperm.xlu0 %2448, %v2380_v11   ;;  %312 = vrot.lane.b32.xlu1 %v2601_v6, %s2487_s24 }
  0x32   :  { %314 = vrot.lane.b32.xlu0 %v2606_v7, %s2487_s24  ;;  %316 = vrot.lane.b32.xlu1 %v2589_v2, %s2487_s24 }
  0x36   :  { %481 = vperm.xlu0 %2448, %v2382_v12   ;;  %318 = vrot.lane.b32.xlu1 %v2593_v4, %s2487_s24 }
  0x3a   :  { %372 = vrot.lane.b32.xlu0 %v2601_v6, %s2488_s27  ;;  %374 = vrot.lane.b32.xlu1 %v2606_v7, %s2488_s27 }
  0x3e   :  { %376 = vrot.lane.b32.xlu0 %v2589_v2, %s2488_s27  ;;  %541 = vperm.xlu1 %2449, %v2384_v13  }
  0x42   :  { %378 = vrot.lane.b32.xlu0 %v2593_v4, %s2488_s27  ;;  %432 = vrot.lane.b32.xlu1 %v2601_v6, %s2489_s0 }
  0x46   :  { %434 = vrot.lane.b32.xlu0 %v2606_v7, %s2489_s0  ;;  %436 = vrot.lane.b32.xlu1 %v2589_v2, %s2489_s0 }
  0x4a   :  { %438 = vrot.lane.b32.xlu0 %v2593_v4, %s2489_s0  ;;  %492 = vrot.lane.b32.xlu1 %v2601_v6, %s2490_s30 }
  0x4e   :  { %494 = vrot.lane.b32.xlu0 %v2606_v7, %s2490_s30  ;;  %496 = vrot.lane.b32.xlu1 %v2589_v2, %s2490_s30 }
  0x52   :  { %555 = vperm.xlu0 %2448, %v552_v14   ;;  %498 = vrot.lane.b32.xlu1 %v2593_v4, %s2490_s30 }
  0x81   :  { %v2660_v15 = vpop.permute.xlu1 %224  ;;  %v2662_v16 = vpop.permute.xlu0 %104 }
  0x85   :  { %v2664_v17 = vpop.permute.xlu0 %164  ;;  %v2666_v18 = vpop.permute.xlu1 %55 }
  0x89   :  { %v2668_v19 = vpop.permute.xlu0 %60  ;;  %v2670_v20 = vpop.permute.xlu1 %62 }
  0x8a   :  { %v67_v46 = vsel %vm66_vm0, %v2668_v19, %v2670_v20 }
  0x8d   :  { %v2672_v21 = vpop.permute.xlu0 %115  ;;  %v119_v22 = vpop.permute.xlu1 %118 }
  0x8e   :  { %v132_v34 = vsel %vm124_vm1, %v2672_v21, %v119_v22 }
  0x8f   :  { %v156_v14 = vmul.f32 %v139_v48, %v132_v34 }
  0x91   :  { %v2674_v23 = vpop.permute.xlu0 %120  ;;  %v2676_v24 = vpop.permute.xlu1 %284 }
  0x92   :  { %v125_v38 = vsel %vm124_vm1, %v119_v22, %v2674_v23  ;;  %v74_v22 = vsel %vm66_vm0, %v2666_v18, %v2668_v19 }
  0x93   :  { %v157_v8 = vmul.f32 %v143_v49, %v125_v38  ;;  %v97_v49 = vmul.f32 %v80_v45, %v74_v22 }
  0x95   :  { %v65_v25 = vpop.permute.xlu0 %64  ;;  %v2678_v26 = vpop.permute.xlu1 %122  ;;  %v168_v38 = vmul.f32 %v2664_v17, %v157_v8 }
  0x96   :  { %v68_v13 = vsel %vm66_vm0, %v2670_v20, %v65_v25  ;;  %v69_v12 = vsel %vm66_vm0, %v65_v25, %v2666_v18  ;;  %v126_v18 = vsel %vm124_vm1, %v2674_v23, %v2678_v26  ;;  %v127_v19 = vsel %vm124_vm1, %v2678_v26, %v2672_v21 }
  0x97   :  { %v99_v25 = vmul.f32 %v88_v51, %v68_v13  ;;  %v100_v5 = vmul.f32 %v92_v52, %v69_v12  ;;  %v98_v23 = vmul.f32 %v84_v47, %v67_v46  ;;  %v516_v21 = vrot.slane %v2824_v31, %v2696_v37 }
  0x98   :  { %v520_v26 = vrot.slane %v2824_v31, %v2703_v39  ;;  %v158_v34 = vmul.f32 %v147_v53, %v126_v18  ;;  %v159_v51 = vmul.f32 %v151_v54, %v127_v19  ;;  %vm1936_vm0 = vcmask 769024  }
  0x99   :  { %v2680_v27 = vpop.permute.xlu0 %175  ;;  %v2682_v28 = vpop.permute.xlu1 %178 }
  0x9a   :  { %v192_v3 = vsel %vm184_vm2, %v2680_v27, %v2682_v28  ;;  %v169_v46 = vmul.f32 %v2664_v17, %v158_v34 }
  0x9d   :  { %v2684_v29 = vpop.permute.xlu0 %180  ;;  %v2686_v30 = vpop.permute.xlu1 %299 }
  0x9e   :  { %v185_v48 = vsel %vm184_vm2, %v2682_v28, %v2684_v29  ;;  %v216_v28 = vmul.f32 %v199_v58, %v192_v3 }
  0x9f   :  { %v217_v45 = vmul.f32 %v203_v59, %v185_v48 }
  0xa1   :  { %v2688_v32 = vpop.permute.xlu0 %182  ;;  %v2690_v33 = vpop.permute.xlu1 %235 }
  0xa2   :  { %v186_v52 = vsel %vm184_vm2, %v2684_v29, %v2688_v32  ;;  %v187_v12 = vsel %vm184_vm2, %v2688_v32, %v2680_v27  ;;  %v167_v29 = vmul.f32 %v2664_v17, %v156_v14  ;;  %v109_v27 = vmul.f32 %v2662_v16, %v99_v25 }
  0xa3   :  { %v110_v32 = vmul.f32 %v2662_v16, %v100_v5  ;;  %v218_v58 = vmul.f32 %v207_v60, %v186_v52  ;;  %v219_v59 = vmul.f32 %v211_v62, %v187_v12  ;;  %v170_v14 = vmul.f32 %v2664_v17, %v159_v51 }
  0xa4   :  { %v107_v62 = vmul.f32 %v2662_v16, %v97_v49  ;;  %v227_v5 = vmul.f32 %v2660_v15, %v216_v28  ;;  %v304_v12 = vmul.f32 %v2686_v30, %v2601_v6  ;;  %v305_v28 = vmul.f32 %v2686_v30, %v2606_v7 }
  0xa5   :  { %v2692_v35 = vpop.permute.xlu0 %238  ;;  %v2694_v36 = vpop.permute.xlu1 %240  ;;  %v229_v48 = vmul.f32 %v2660_v15, %v218_v58  ;;  %v230_v49 = vmul.f32 %v2660_v15, %v219_v59  ;;  %v174_v34 = vadd.f32 %v170_v14, %v110_v32  ;;  %v306_v6 = vmul.f32 %v2686_v30, %v2589_v2 }
  0xa6   :  { %v252_v47 = vsel %vm244_vm3, %v2690_v33, %v2692_v35  ;;  %v245_v13 = vsel %vm244_vm3, %v2692_v35, %v2694_v36  ;;  %v171_v18 = vadd.f32 %v167_v29, %v107_v62  ;;  %v307_v7 = vmul.f32 %v2686_v30, %v2593_v4 }
  0xa7   :  { %v276_v8 = vmul.f32 %v259_v63, %v252_v47  ;;  %v277_v60 = vmul.f32 %v263_v0, %v245_v13  ;;  %v3971_v63 = vrot.slane %v2734_v50, %v2712_v42  ;;  %v524_v0 = vrot.slane %v2824_v31, %v2710_v41 }
  0xa8   :  { %v231_v50 = vadd.f32 %v227_v5, %v171_v18  ;;  %v234_v32 = vadd.f32 %v230_v49, %v174_v34  ;;  %v3973_v2 = vrot.slane %v2751_v57, %v2703_v39  ;;  %v3974_v5 = vrot.slane %v2762_v61, %v2696_v37 }
  0xa9   :  { %v2714_v43 = vpop.permute.xlu0 %361  ;;  %v2716_v44 = vpop.permute.xlu1 %242  ;;  %v288_v51 = vmul.f32 %v2676_v24, %v277_v60  ;;  %v3976_v18 = vrot.slane %v2751_v57, %v2710_v41 }
  0xaa   :  { %v246_v3 = vsel %vm244_vm3, %v2694_v36, %v2716_v44  ;;  %v247_v35 = vsel %vm244_vm3, %v2716_v44, %v2690_v33  ;;  %v108_v36 = vmul.f32 %v2662_v16, %v98_v23  ;;  %v228_v33 = vmul.f32 %v2660_v15, %v217_v45 }
  0xab   :  { %v278_v17 = vmul.f32 %v267_v1, %v246_v3  ;;  %v279_v25 = vmul.f32 %v3971_v63, %v247_v35  ;;  %v528_v16 = vrot.slane %v2824_v31, %v2712_v42  ;;  %v173_v23 = vadd.f32 %v169_v46, %v109_v27 }
  0xac   :  { %v172_v19 = vadd.f32 %v168_v38, %v108_v36  ;;  %v287_v1 = vmul.f32 %v2676_v24, %v276_v8  ;;  %v3972_v35 = vrot.slane %v2751_v57, %v2696_v37 }
  0xad   :  { %v2744_v55 = vpop.permute.xlu0 %421  ;;  %v2746_v56 = vpop.permute.xlu1 %312  ;;  %v289_v13 = vmul.f32 %v2676_v24, %v278_v17  ;;  %v290_v15 = vmul.f32 %v2676_v24, %v279_v25  ;;  %v233_v27 = vadd.f32 %v229_v48, %v173_v23  ;;  %v3975_v17 = vrot.slane %v2762_v61, %v2703_v39 }
  0xae   :  { %v232_v52 = vadd.f32 %v228_v33, %v172_v19  ;;  %v291_v58 = vadd.f32 %v287_v1, %v231_v50  ;;  %v3977_v48 = vrot.slane %v2751_v57, %v2712_v42  ;;  %v3981_v57 = vrot.slane %v2762_v61, %v2712_v42 }
  0xaf   :  { %v293_v60 = vadd.f32 %v289_v13, %v233_v27 }
  0xb0   :  { %v292_v59 = vadd.f32 %v288_v51, %v232_v52 }
  0xb1   :  { %v2783_v10 = vpop.permute.xlu0 %314  ;;  %v2785_v11 = vpop.permute.xlu1 %316 }
  0xb2   :  { %v321_v29 = vsel %vm320_vm4, %v2746_v56, %v2783_v10  ;;  %v322_v38 = vsel %vm320_vm4, %v2783_v10, %v2785_v11  ;;  %v309_v25 = vadd.f32 %v305_v28, %v292_v59 }
  0xb3   :  { %v353_v10 = vmul.f32 %v3972_v35, %v321_v29  ;;  %v354_v46 = vmul.f32 %v3973_v2, %v322_v38  ;;  %v310_v29 = vadd.f32 %v306_v6, %v293_v60 }
  0xb5   :  { %v2832_v20 = vpop.permute.xlu0 %481  ;;  %v2834_v40 = vpop.permute.xlu1 %318  ;;  %v364_v23 = vmul.f32 %v2714_v43, %v353_v10  ;;  %v365_v34 = vmul.f32 %v2714_v43, %v354_v46 }
  0xb6   :  { %v323_v4 = vsel %vm320_vm4, %v2785_v11, %v2834_v40  ;;  %v329_v30 = vsel %vm320_vm4, %v2834_v40, %v2746_v56  ;;  %v308_v40 = vadd.f32 %v304_v12, %v291_v58  ;;  %v3980_v12 = vrot.slane %v2762_v61, %v2710_v41 }
  0xb7   :  { %v355_v19 = vmul.f32 %v3976_v18, %v323_v4  ;;  %v356_v49 = vmul.f32 %v3977_v48, %v329_v30  ;;  %v3983_v61 = vrot.slane %v2781_v9, %v2712_v42 }
  0xb8   :  { %v368_v10 = vadd.f32 %v364_v23, %v308_v40 }
  0xb9   :  { %v2858_v53 = vpop.permute.xlu0 %372  ;;  %v375_v54 = vpop.permute.xlu1 %374  ;;  %v366_v58 = vmul.f32 %v2714_v43, %v355_v19  ;;  %v367_v59 = vmul.f32 %v2714_v43, %v356_v49 }
  0xba   :  { %v381_v24 = vsel %vm380_vm5, %v2858_v53, %v375_v54 }
  0xbb   :  { %v413_v33 = vmul.f32 %v3974_v5, %v381_v24  ;;  %v3982_v24 = vrot.slane %v2781_v9, %v2710_v41 }
  0xbd   :  { %v377_v44 = vpop.permute.xlu0 %376  ;;  %v2882_v22 = vpop.permute.xlu1 %541  ;;  %v424_v27 = vmul.f32 %v2744_v55, %v413_v33 }
  0xbe   :  { %v382_v3 = vsel %vm380_vm5, %v375_v54, %v377_v44  ;;  %v294_v54 = vadd.f32 %v290_v15, %v234_v32 }
  0xbf   :  { %v414_v11 = vmul.f32 %v3975_v17, %v382_v3 }
  0xc0   :  { %v311_v38 = vadd.f32 %v307_v7, %v294_v54 }
  0xc1   :  { %v379_v45 = vpop.permute.xlu0 %378  ;;  %v433_v47 = vpop.permute.xlu1 %432  ;;  %v425_v32 = vmul.f32 %v2744_v55, %v414_v11 }
  0xc2   :  { %v383_v63 = vsel %vm380_vm5, %v377_v44, %v379_v45  ;;  %v389_v56 = vsel %vm380_vm5, %v379_v45, %v2858_v53  ;;  %v3978_v44 = vrot.slane %v2781_v9, %v2696_v37  ;;  %v3979_v53 = vrot.slane %v2781_v9, %v2703_v39 }
  0xc3   :  { %v415_v28 = vmul.f32 %v3980_v12, %v383_v63  ;;  %v416_v45 = vmul.f32 %v3981_v57, %v389_v56 }
  0xc5   :  { %v435_v14 = vpop.permute.xlu0 %434  ;;  %v437_v8 = vpop.permute.xlu1 %436  ;;  %v426_v4 = vmul.f32 %v2744_v55, %v415_v28  ;;  %v427_v43 = vmul.f32 %v2744_v55, %v416_v45 }
  0xc6   :  { %v441_v62 = vsel %vm440_vm6, %v433_v47, %v435_v14  ;;  %v442_v36 = vsel %vm440_vm6, %v435_v14, %v437_v8 }
  0xc7   :  { %v473_v1 = vmul.f32 %v3978_v44, %v441_v62  ;;  %v474_v51 = vmul.f32 %v3979_v53, %v442_v36  ;;  %v370_v62 = vadd.f32 %v366_v58, %v310_v29  ;;  %v371_v36 = vadd.f32 %v367_v59, %v311_v38 }
  0xc9   :  { %v439_v50 = vpop.permute.xlu0 %438  ;;  %v493_v52 = vpop.permute.xlu1 %492  ;;  %v484_v6 = vmul.f32 %v2832_v20, %v473_v1  ;;  %v485_v7 = vmul.f32 %v2832_v20, %v474_v51  ;;  %v430_v40 = vadd.f32 %v426_v4, %v370_v62  ;;  %v563_v4 = vld [vmem:[%s3956_s4] sm:$0xf]  ;;  %v2406_v62 = vld [vmem:[%s3957_s5 + $0x4c] sm:$0xf]  ;;  %s2491_s4 = smov 34  }
  0xca   :  { %v443_v13 = vsel %vm440_vm6, %v437_v8, %v439_v50  ;;  %v449_v15 = vsel %vm440_vm6, %v439_v50, %v433_v47  ;;  %v369_v47 = vadd.f32 %v365_v34, %v309_v25  ;;  %v428_v8 = vadd.f32 %v424_v27, %v368_v10 }
  0xcb   :  { %v475_v3 = vmul.f32 %v3982_v24, %v443_v13  ;;  %v476_v35 = vmul.f32 %v3983_v61, %v449_v15  ;;  %v431_v25 = vadd.f32 %v427_v43, %v371_v36  ;;  %v2385_v43 = vld [vmem:[%s3957_s5 + $0x4] sm:$0xf]  ;;  %v2411_v36 = vld [vmem:[%s3957_s5 + $0x5c] sm:$0xf] }
  0xcc   :  { %v429_v60 = vadd.f32 %v425_v32, %v369_v47  ;;  %v488_v33 = vadd.f32 %v484_v6, %v428_v8  ;;  %v2392_v8 = vld [vmem:[%s3957_s5 + $0x1c] sm:$0xf] }
  0xcd   :  { %v495_v2 = vpop.permute.xlu0 %494  ;;  %v497_v46 = vpop.permute.xlu1 %496  ;;  %v486_v5 = vmul.f32 %v2832_v20, %v475_v3  ;;  %v487_v55 = vmul.f32 %v2832_v20, %v476_v35 }
  0xce   :  { %v501_v30 = vsel %vm500_vm7, %v493_v52, %v495_v2  ;;  %v502_v14 = vsel %vm500_vm7, %v495_v2, %v497_v46  ;;  %v489_v17 = vadd.f32 %v485_v7, %v429_v60  ;;  %v2397_v60 = vld [vmem:[%s3957_s5 + $0x2c] sm:$0xf] }
  0xcf   :  { %v533_v9 = vmul.f32 %v516_v21, %v501_v30  ;;  %v534_v54 = vmul.f32 %v520_v26, %v502_v14  ;;  %v490_v49 = vadd.f32 %v486_v5, %v430_v40  ;;  %v491_v23 = vadd.f32 %v487_v55, %v431_v25  ;;  %v2386_v30 = vld [vmem:[%s3957_s5 + $0x8] sm:$0xf]  ;;  %v2387_v14 = vld [vmem:[%s3957_s5 + $0xc] sm:$0xf]  ;;  %v2389_v40 = vld [vmem:[%s3957_s5 + $0x10] sm:$0xf] }
  0xd0   :  { %v2390_v25 = vld [vmem:[%s3957_s5 + $0x14] sm:$0xf] }
  0xd1   :  { %v544_v11 = vmul.f32 %v2882_v22, %v533_v9  ;;  %v545_v63 = vmul.f32 %v2882_v22, %v534_v54  ;;  %v499_v56 = vpop.permute.xlu1 %498  ;;  %v556_v34 = vpop.permute.xlu0 %555  ;;  %v2402_v9 = vld [vmem:[%s3957_s5 + $0x3c] sm:$0xf]  ;;  %v2404_v54 = vld [vmem:[%s3957_s5 + $0x44] sm:$0xf] }
  0xd2   :  { %v503_v21 = vsel %vm500_vm7, %v497_v46, %v499_v56  ;;  %v509_v18 = vsel %vm500_vm7, %v499_v56, %v493_v52  ;;  %v667_v56 = vld [vmem:[%s3957_s5] sm:$0xf] }
  0xd3   :  { %v548_v26 = vadd.f32 %v544_v11, %v488_v33  ;;  %v549_v19 = vadd.f32 %v545_v63, %v489_v17  ;;  %v535_v48 = vmul.f32 %v524_v0, %v503_v21  ;;  %v536_v20 = vmul.f32 %v528_v16, %v509_v18  ;;  %v562_v17 = vld [vmem:[%s3955_s3] sm:$0xf]  ;;  %v2391_v21 = vld [vmem:[%s3957_s5 + $0x18] sm:$0xf] }
  0xd4   :  { %v2394_v18 = vld [vmem:[%s3957_s5 + $0x20] sm:$0xf] }
  0xd5   :  { %v558_v44 = vadd.f32 %v556_v34, %v548_v26  ;;  %v559_v1 = vadd.f32 %v556_v34, %v549_v19  ;;  %v546_v53 = vmul.f32 %v2882_v22, %v535_v48  ;;  %v547_v51 = vmul.f32 %v2882_v22, %v536_v20  ;;  %v2395_v26 = vld [vmem:[%s3957_s5 + $0x24] sm:$0xf]  ;;  %v2396_v19 = vld [vmem:[%s3957_s5 + $0x28] sm:$0xf]  ;;  %v2399_v48 = vld [vmem:[%s3957_s5 + $0x30] sm:$0xf] }
  0xd6   :  { %v2400_v20 = vld [vmem:[%s3957_s5 + $0x34] sm:$0xf] }
  0xd7   :  { %v550_v50 = vadd.f32 %v546_v53, %v490_v49  ;;  %v551_v52 = vadd.f32 %v547_v51, %v491_v23  ;;  %v565_v12 = vsel %vm564_vm8, %v558_v44, 0.0  ;;  %v566_v0 = vsel %vm564_vm8, %v559_v1, 0.0  ;;  %v2401_v49 = vld [vmem:[%s3957_s5 + $0x38] sm:$0xf]  ;;  %v2403_v23 = vld [vmem:[%s3957_s5 + $0x40] sm:$0xf] }
  0xd8   :  { %v567_v31 = vadd.f32 %v566_v0, %v565_v12  ;;  %v2410_v53 = vld [vmem:[%s3957_s5 + $0x58] sm:$0xf] }
  0xd9   :  { %v560_v28 = vadd.f32 %v556_v34, %v550_v50  ;;  %v561_v57 = vadd.f32 %v556_v34, %v551_v52  ;;  %v2405_v34 = vld [vmem:[%s3957_s5 + $0x48] sm:$0xf] }
  0xdb   :  { %v568_v16 = vsel %vm564_vm8, %v560_v28, 0.0  ;;  %v570_v13 = vsel %vm564_vm8, %v561_v57, 0.0 }
  0xdc   :  { %v569_v45 = vadd.f32 %v568_v16, %v567_v31 }
  0xde   :  { %v571_v15 = vadd.f32 %v570_v13, %v569_v45 }
  0xe0   :  { %572 = vadd.xlane.f32.xlu0 %v571_v15 }
 0x16d   :  { %v573_v29 = vpop.xlane.xlu0 %572 }
 0x16e   :  { %v575_v38 = vmul.f32 0.001953125, %v573_v29 }
 0x170   :  { %v3002_v27 = vsub.f32 %v558_v44, %v575_v38  ;;  %v3004_v22 = vsub.f32 %v559_v1, %v575_v38  ;;  %v3006_v32 = vsub.f32 %v560_v28, %v575_v38  ;;  %v3008_v58 = vsub.f32 %v561_v57, %v575_v38  ;;  %v2408_v44 = vld [vmem:[%s3957_s5 + $0x50] sm:$0xf]  ;;  %v2409_v1 = vld [vmem:[%s3957_s5 + $0x54] sm:$0xf] }
 0x172   :  { %v580_v59 = vmul.f32 %v3002_v27, %v3002_v27  ;;  %v581_v24 = vmul.f32 %v3004_v22, %v3004_v22  ;;  %v582_v3 = vmul.f32 %v3006_v32, %v3006_v32  ;;  %v583_v61 = vmul.f32 %v3008_v58, %v3008_v58 }
 0x174   :  { %v584_v35 = vsel %vm564_vm8, %v580_v59, 0.0  ;;  %v585_v10 = vsel %vm564_vm8, %v581_v24, 0.0  ;;  %v587_v6 = vsel %vm564_vm8, %v582_v3, 0.0  ;;  %v589_v2 = vsel %vm564_vm8, %v583_v61, 0.0  ;;  %v2416_v59 = vld [vmem:[%s3957_s5 + $0x6c] sm:$0xf] }
 0x175   :  { %v586_v47 = vadd.f32 %v585_v10, %v584_v35  ;;  %v2418_v3 = vld [vmem:[%s3957_s5 + $0x70] sm:$0xf]  ;;  %v2419_v61 = vld [vmem:[%s3957_s5 + $0x74] sm:$0xf] }
 0x177   :  { %v588_v7 = vadd.f32 %v587_v6, %v586_v47  ;;  %v2420_v47 = vld [vmem:[%s3957_s5 + $0x78] sm:$0xf]  ;;  %v2421_v6 = vld [vmem:[%s3957_s5 + $0x7c] sm:$0xf] }
 0x179   :  { %v590_v46 = vadd.f32 %v589_v2, %v588_v7  ;;  %v2423_v2 = vld [vmem:[%s3957_s5 + $0x80] sm:$0xf] }
 0x17b   :  { %591 = vadd.xlane.f32.xlu1 %v590_v46 }
 0x18c   :  { %608 = vperm.xlu1 %2449, %v563_v4   ;;  %v2424_v4 = vld [vmem:[%s3957_s5 + $0x84] sm:$0xf] }
 0x190   :  { %701 = vperm.xlu1 %2449, %v2385_v43  }
 0x194   :  { %732 = vperm.xlu1 %2449, %v2386_v30  }
 0x198   :  { %763 = vperm.xlu1 %2449, %v2387_v14  }
 0x19c   :  { %932 = vperm.xlu1 %2449, %v2392_v8  }
 0x1a0   :  { %1101 = vperm.xlu1 %2449, %v2397_v60   ;;  %v2425_v60 = vld [vmem:[%s3957_s5 + $0x88] sm:$0xf] }
 0x1a4   :  { %1270 = vperm.xlu1 %2449, %v2402_v9   ;;  %v2097_v9 = vld [vmem:[%s3958_s6] sm:$0xf] }
 0x1a8   :  { %1332 = vperm.xlu1 %2449, %v2404_v54  }
 0x1ac   :  { %1394 = vperm.xlu1 %2449, %v2406_v62  }
 0x1b0   :  { %1563 = vperm.xlu1 %2449, %v2411_v36  }
 0x208   :  { %v592_v5 = vpop.xlane.xlu1 %591 }
 0x209   :  { %v593_v55 = vmul.f32 0.001953125, %v592_v5 }
 0x20b   :  { %v594_v33 = vadd.f32 1e-05, %v593_v55 }
 0x20c   :  { %v609_v0 = vpop.permute.xlu1 %608 }
 0x20d   :  { %2452 = vrsqrt.f32 %v594_v33 }
 0x210   :  { %v3177_v43 = vpop.permute.xlu1 %701 }
 0x214   :  { %v3182_v14 = vpop.permute.xlu1 %732 }
 0x217   :  { %v2453_v11 = vpop.eup %2452 }
 0x218   :  { %v596_v63 = vmul.f32 %v2453_v11, %v562_v17  ;;  %v3195_v54 = vpop.permute.xlu1 %763 }
 0x21a   :  { %599 = vperm.xlu0 %2448, %v596_v63   ;;  %v2426_v63 = vld [vmem:[%s3957_s5 + $0x8c] sm:$0xf] }
 0x21c   :  { %v3200_v36 = vpop.permute.xlu1 %932 }
 0x21e   :  { %670 = vperm.xlu0 %2448, %v667_v56  }
 0x220   :  { %v3206_v55 = vpop.permute.xlu1 %1101 }
 0x222   :  { %839 = vperm.xlu0 %2448, %v2389_v40  }
 0x224   :  { %v3211_v17 = vpop.permute.xlu1 %1270 }
 0x226   :  { %870 = vperm.xlu0 %2448, %v2390_v25  }
 0x228   :  { %v1333_v56 = vpop.permute.xlu1 %1332 }
 0x22a   :  { %901 = vperm.xlu0 %2448, %v2391_v21  }
 0x22c   :  { %v1395_v25 = vpop.permute.xlu1 %1394 }
 0x22e   :  { %1008 = vperm.xlu0 %2448, %v2394_v18   ;;  %v3226_v18 = vld [vmem:[%s3966_s14] sm:$0xf] }
 0x232   :  { %1039 = vperm.xlu0 %2448, %v2395_v26   ;;  %v646_v26 = vrot.slane %v3226_v18, %v2696_v37 }
 0x236   :  { %1070 = vperm.xlu0 %2448, %v2396_v19   ;;  %v650_v19 = vrot.slane %v3226_v18, %v2703_v39 }
 0x23a   :  { %1177 = vperm.xlu0 %2448, %v2399_v48  }
 0x23e   :  { %1208 = vperm.xlu0 %2448, %v2400_v20   ;;  %v3234_v20 = vpop.permute.xlu1 %1563 }
 0x23f   :  { %3984 = vst [vmem:[#allocation5_spill] sm:$0xff] %v3234_v20 }
 0x242   :  { %1239 = vperm.xlu0 %2448, %v2401_v49  }
 0x246   :  { %1301 = vperm.xlu0 %2448, %v2403_v23  }
 0x24a   :  { %1363 = vperm.xlu0 %2448, %v2405_v34  }
 0x24e   :  { %1470 = vperm.xlu0 %2448, %v2408_v44  }
 0x252   :  { %1501 = vperm.xlu0 %2448, %v2409_v1  }
 0x256   :  { %1532 = vperm.xlu0 %2448, %v2410_v53  }
 0x299   :  { %v600_v51 = vpop.permute.xlu0 %599 }
 0x29a   :  { %v602_v50 = vmul.f32 %v600_v51, %v3002_v27  ;;  %v603_v52 = vmul.f32 %v600_v51, %v3004_v22  ;;  %v605_v12 = vmul.f32 %v600_v51, %v3008_v58  ;;  %v604_v31 = vmul.f32 %v600_v51, %v3006_v32  ;;  %v2413_v27 = vld [vmem:[%s3957_s5 + $0x60] sm:$0xf]  ;;  %v2414_v22 = vld [vmem:[%s3957_s5 + $0x64] sm:$0xf]  ;;  %v2415_v58 = vld [vmem:[%s3957_s5 + $0x68] sm:$0xf] }
 0x29b   :  { %v3251_v51 = vld [vmem:[%s3966_s14 + $0x4] sm:$0xf] }
 0x29c   :  { %v611_v28 = vadd.f32 %v609_v0, %v602_v50  ;;  %v614_v57 = vadd.f32 %v609_v0, %v605_v12  ;;  %v612_v16 = vadd.f32 %v609_v0, %v603_v52  ;;  %v613_v15 = vadd.f32 %v609_v0, %v604_v31 }
 0x29d   :  { %v3130_v32 = vpop.permute.xlu0 %670 }
 0x29e   :  { %v3104_v45 = vmax.f32 %v611_v28, 0.0  ;;  %v3106_v13 = vmax.f32 %v614_v57, 0.0  ;;  %v3110_v29 = vmax.f32 %v612_v16, 0.0  ;;  %v3114_v38 = vmax.f32 %v613_v15, 0.0 }
 0x2a0   :  { %620 = vrot.lane.b32.xlu0 %v3106_v13, %s2491_s4  ;;  %626 = vrot.lane.b32.xlu1 %v3104_v45, %s2491_s4  ;;  %v1307_v49 = vrot.slane %v3104_v45, %v2696_v37  ;;  %v1311_v23 = vrot.slane %v3110_v29, %v2696_v37  ;;  %v1338_v1 = vrot.slane %v3104_v45, %v2703_v39 }
 0x2a1   :  { %v3140_v24 = vpop.permute.xlu0 %839  ;;  %v1315_v53 = vrot.slane %v3114_v38, %v2696_v37  ;;  %v1342_v50 = vrot.slane %v3110_v29, %v2703_v39  ;;  %v1346_v52 = vrot.slane %v3114_v38, %v2703_v39  ;;  %v1350_v12 = vrot.slane %v3106_v13, %v2703_v39 }
 0x2a2   :  { %v1319_v0 = vrot.slane %v3106_v13, %v2696_v37  ;;  %v1369_v28 = vrot.slane %v3104_v45, %v2710_v41  ;;  %v1373_v57 = vrot.slane %v3110_v29, %v2710_v41  ;;  %v1400_v31 = vrot.slane %v3104_v45, %v2712_v42 }
 0x2a3   :  { %v1377_v16 = vrot.slane %v3114_v38, %v2710_v41  ;;  %v1404_v15 = vrot.slane %v3110_v29, %v2712_v42 }
 0x2a4   :  { %628 = vrot.lane.b32.xlu0 %v3110_v29, %s2491_s4  ;;  %790 = vrot.lane.b32.xlu1 %v3106_v13, %s2492_s23 }
 0x2a5   :  { %v3149_v35 = vpop.permute.xlu0 %870 }
 0x2a8   :  { %630 = vrot.lane.b32.xlu0 %v3114_v38, %s2491_s4  ;;  %795 = vrot.lane.b32.xlu1 %v3110_v29, %s2492_s23  ;;  %s2496_s4 = smov 98  }
 0x2a9   :  { %v3152_v10 = vpop.permute.xlu0 %901 }
 0x2ac   :  { %793 = vrot.lane.b32.xlu0 %v3104_v45, %s2492_s23  ;;  %797 = vrot.lane.b32.xlu1 %v3114_v38, %s2492_s23 }
 0x2ad   :  { %v3162_v7 = vpop.permute.xlu0 %1008 }
 0x2b0   :  { %1639 = vperm.xlu0 %2448, %v2413_v27   ;;  %959 = vrot.lane.b32.xlu1 %v3106_v13, %s2493_s26  ;;  %v1408_v27 = vrot.slane %v3114_v38, %v2712_v42 }
 0x2b1   :  { %v3169_v46 = vpop.permute.xlu0 %1039 }
 0x2b4   :  { %962 = vrot.lane.b32.xlu0 %v3104_v45, %s2493_s26  ;;  %964 = vrot.lane.b32.xlu1 %v3110_v29, %s2493_s26 }
 0x2b5   :  { %v3179_v30 = vpop.permute.xlu0 %1070 }
 0x2b8   :  { %1670 = vperm.xlu0 %2448, %v2414_v22   ;;  %966 = vrot.lane.b32.xlu1 %v3114_v38, %s2493_s26  ;;  %v1412_v22 = vrot.slane %v3106_v13, %v2712_v42 }
 0x2b9   :  { %v3184_v8 = vpop.permute.xlu0 %1177 }
 0x2bc   :  { %1131 = vrot.lane.b32.xlu0 %v3104_v45, %s2494_s29  ;;  %1128 = vrot.lane.b32.xlu1 %v3106_v13, %s2494_s29 }
 0x2bd   :  { %v3197_v62 = vpop.permute.xlu0 %1208 }
 0x2c0   :  { %1701 = vperm.xlu0 %2448, %v2415_v58   ;;  %1732 = vperm.xlu1 %2449, %v2416_v59   ;;  %v1381_v58 = vrot.slane %v3106_v13, %v2710_v41 }
 0x2c1   :  { %v3202_v5 = vpop.permute.xlu0 %1239 }
 0x2c4   :  { %1808 = vperm.xlu0 %2448, %v2418_v3   ;;  %1133 = vrot.lane.b32.xlu1 %v3110_v29, %s2494_s29 }
 0x2c5   :  { %v3208_v33 = vpop.permute.xlu0 %1301 }
 0x2c8   :  { %1839 = vperm.xlu0 %2448, %v2419_v61   ;;  %1135 = vrot.lane.b32.xlu1 %v3114_v38, %s2494_s29 }
 0x2c9   :  { %v3213_v11 = vpop.permute.xlu0 %1363 }
 0x2ca   :  { %v3352_v61 = vmul.f32 %v1373_v57, %v3213_v11 }
 0x2cc   :  { %1423 = vrot.lane.b32.xlu0 %v3110_v29, %s2495_s19  ;;  %1421 = vrot.lane.b32.xlu1 %v3104_v45, %s2495_s19 }
 0x2cd   :  { %v3219_v40 = vpop.permute.xlu0 %1470 }
 0x2d0   :  { %1870 = vperm.xlu0 %2448, %v2420_v47   ;;  %1901 = vperm.xlu1 %2449, %v2421_v6   ;;  %v3289_v6 = vmul.f32 %v1342_v50, %v1333_v56  ;;  %v3308_v50 = vld [vmem:[%s3966_s14 + $0xc] sm:$0xf] }
 0x2d1   :  { %v3221_v21 = vpop.permute.xlu0 %1501 }
 0x2d4   :  { %1592 = vrot.lane.b32.xlu0 %v3110_v29, %s2496_s4  ;;  %1425 = vrot.lane.b32.xlu1 %v3114_v38, %s2495_s19 }
 0x2d5   :  { %v3240_v34 = vpop.permute.xlu0 %1532 }
 0x2d8   :  { %1977 = vperm.xlu0 %2448, %v2423_v2   ;;  %1427 = vrot.lane.b32.xlu1 %v3106_v13, %s2495_s19  ;;  %v3293_v2 = vmul.f32 %v1350_v12, %v1333_v56  ;;  %v3317_v12 = vmul.f32 %v1307_v49, %v3208_v33 }
 0x2da   :  { %3986 = vst [vmem:[#allocation7_spill] sm:$0xff] %v3293_v2 }
 0x2dc   :  { %1761 = vrot.lane.b32.xlu0 %v3110_v29, %s2497_s25  ;;  %1590 = vrot.lane.b32.xlu1 %v3104_v45, %s2496_s4 }
 0x2e0   :  { %2008 = vperm.xlu0 %2448, %v2424_v4   ;;  %1594 = vrot.lane.b32.xlu1 %v3114_v38, %s2496_s4 }
 0x2e4   :  { %1930 = vrot.lane.b32.xlu0 %v3110_v29, %s2498_s28  ;;  %1596 = vrot.lane.b32.xlu1 %v3106_v13, %s2496_s4  ;;  %v3284_v29 = vld [vmem:[%s3966_s14 + $0x8] sm:$0xf] }
 0x2e8   :  { %2039 = vperm.xlu0 %2448, %v2425_v60   ;;  %1759 = vrot.lane.b32.xlu1 %v3104_v45, %s2497_s25  ;;  %v3996_v60 = vrot.slane %v3226_v18, %v2712_v42 }
 0x2ec   :  { %2100 = vperm.xlu0 %2448, %v2097_v9   ;;  %1763 = vrot.lane.b32.xlu1 %v3114_v38, %s2497_s25  ;;  %v3341_v9 = vmul.f32 %v1315_v53, %v3208_v33 }
 0x2ee   :  { %3990 = vst [vmem:[#allocation11_spill] sm:$0xff] %v3341_v9 }
 0x2f0   :  { %1765 = vrot.lane.b32.xlu1 %v3106_v13, %s2497_s25 }
 0x2f4   :  { %1928 = vrot.lane.b32.xlu1 %v3104_v45, %s2498_s28  ;;  %v3358_v45 = vmul.f32 %v1381_v58, %v3213_v11 }
 0x2f6   :  { %3993 = vst [vmem:[#allocation14_spill] sm:$0xff] %v3358_v45 }
 0x2f8   :  { %1932 = vrot.lane.b32.xlu1 %v3114_v38, %s2498_s28  ;;  %v3286_v38 = vmul.f32 %v1338_v1, %v1333_v56  ;;  %v3338_v1 = vld [vmem:[%s3966_s14 + $0x14] sm:$0xf] }
 0x2fc   :  { %1934 = vrot.lane.b32.xlu1 %v3106_v13, %s2498_s28  ;;  %v3291_v13 = vmul.f32 %v1346_v52, %v1333_v56  ;;  %v3310_v56 = vmul.f32 %v1404_v15, %v1395_v25  ;;  %v3314_v52 = vmul.f32 %v1412_v22, %v1395_v25  ;;  %v3344_v15 = vmul.f32 %v1319_v0, %v3208_v33 }
 0x2fe   :  { %3985 = vst [vmem:[#allocation6_spill] sm:$0xff] %v3291_v13  ;;  %3987 = vst [vmem:[#allocation8_spill] sm:$0xff] %v3310_v56 }
 0x2ff   :  { %3989 = vst [vmem:[#allocation10_spill] sm:$0xff] %v3314_v52  ;;  %3991 = vst [vmem:[#allocation12_spill] sm:$0xff] %v3344_v15 }
 0x300   :  { %2070 = vperm.xlu1 %2449, %v2426_v63   ;;  %v3301_v63 = vmul.f32 %v1400_v31, %v1395_v25 }
 0x312   :  { %v621_v59 = vpop.permute.xlu0 %620  ;;  %v627_v3 = vpop.permute.xlu1 %626 }
 0x313   :  { %v640_v47 = vsel %vm632_vm9, %v621_v59, %v627_v3 }
 0x314   :  { %v3295_v4 = vmul.f32 %v646_v26, %v640_v47  ;;  %v3312_v26 = vmul.f32 %v1408_v27, %v1395_v25  ;;  %v3328_v27 = vmul.f32 %v1311_v23, %v3208_v33  ;;  %v3347_v23 = vmul.f32 %v1369_v28, %v3213_v11 }
 0x316   :  { %3988 = vst [vmem:[#allocation9_spill] sm:$0xff] %v3312_v26  ;;  %v629_v47 = vpop.permute.xlu0 %628  ;;  %v3319_v31 = vpop.permute.xlu1 %790  ;;  %v676_v25 = vrot.slane %v3295_v4, %v2696_v37  ;;  %v707_v49 = vrot.slane %v3295_v4, %v2703_v39 }
 0x317   :  { %v633_v22 = vsel %vm632_vm9, %v627_v3, %v629_v47  ;;  %v3355_v3 = vmul.f32 %v1377_v16, %v3213_v11  ;;  %v3373_v11 = vld [vmem:[%s3966_s14 + $0x18] sm:$0xf] }
 0x318   :  { %v3360_v53 = vmul.f32 %v650_v19, %v633_v22  ;;  %3994 = vst [vmem:[#allocation15_spill] sm:$0xff] %v3373_v11  ;;  %v689_v19 = vmul.f32 %v676_v25, %v3130_v32  ;;  %v720_v58 = vmul.f32 %v707_v49, %v3177_v43 }
 0x319   :  { %3992 = vst [vmem:[#allocation13_spill] sm:$0xff] %v3355_v3 }
 0x31a   :  { %v631_v44 = vpop.permute.xlu0 %630  ;;  %v796_v33 = vpop.permute.xlu1 %795  ;;  %v680_v22 = vrot.slane %v3360_v53, %v2696_v37  ;;  %v711_v28 = vrot.slane %v3360_v53, %v2703_v39  ;;  %v724_v48 = vadd.f32 %v720_v58, %v689_v19  ;;  %v742_v56 = vrot.slane %v3360_v53, %v2710_v41 }
 0x31b   :  { %v634_v57 = vsel %vm632_vm9, %v629_v47, %v631_v44  ;;  %v635_v0 = vsel %vm632_vm9, %v631_v44, %v621_v59  ;;  %v738_v44 = vrot.slane %v3295_v4, %v2710_v41  ;;  %v3995_v59 = vrot.slane %v3226_v18, %v2710_v41 }
 0x31c   :  { %v666_v25 = vmul.f32 %v3996_v60, %v635_v0  ;;  %v769_v47 = vrot.slane %v3295_v4, %v2712_v42  ;;  %v690_v45 = vmul.f32 %v680_v22, %v3130_v32  ;;  %v721_v3 = vmul.f32 %v711_v28, %v3177_v43 }
 0x31d   :  { %v665_v16 = vmul.f32 %v3995_v59, %v634_v57  ;;  %v751_v2 = vmul.f32 %v738_v44, %v3182_v14 }
 0x31e   :  { %v794_v52 = vpop.permute.xlu0 %793  ;;  %v798_v26 = vpop.permute.xlu1 %797  ;;  %v688_v57 = vrot.slane %v666_v25, %v2696_v37  ;;  %v719_v60 = vrot.slane %v666_v25, %v2703_v39  ;;  %v750_v59 = vrot.slane %v666_v25, %v2710_v41  ;;  %v782_v13 = vmul.f32 %v769_v47, %v3195_v54 }
 0x31f   :  { %v684_v20 = vrot.slane %v665_v16, %v2696_v37  ;;  %v715_v18 = vrot.slane %v665_v16, %v2703_v39  ;;  %v746_v0 = vrot.slane %v665_v16, %v2710_v41  ;;  %v800_v19 = vsel %vm799_vm10, %v794_v52, %v796_v33 }
 0x320   :  { %v807_v4 = vsel %vm799_vm10, %v3319_v31, %v794_v52  ;;  %v692_v28 = vmul.f32 %v688_v57, %v3130_v32  ;;  %v723_v49 = vmul.f32 %v719_v60, %v3177_v43  ;;  %v773_v52 = vrot.slane %v3360_v53, %v2712_v42  ;;  %v3445_v53 = vld [vmem:[%s3966_s14 + $0x1c] sm:$0xf] }
 0x321   :  { %v691_v58 = vmul.f32 %v684_v20, %v3130_v32  ;;  %v722_v22 = vmul.f32 %v715_v18, %v3177_v43  ;;  %v3997_v32 = vrot.slane %v3251_v51, %v2696_v37  ;;  %v801_v43 = vsel %vm799_vm10, %v796_v33, %v798_v26 }
 0x322   :  { %v3422_v11 = vpop.permute.xlu1 %959  ;;  %v727_v20 = vadd.f32 %v723_v49, %v692_v28  ;;  %v755_v18 = vadd.f32 %v751_v2, %v724_v48  ;;  %v725_v60 = vadd.f32 %v721_v3, %v690_v45  ;;  %v777_v44 = vrot.slane %v665_v16, %v2712_v42 }
 0x323   :  { %v726_v15 = vadd.f32 %v722_v22, %v691_v58  ;;  %v3433_v57 = vmul.f32 %v3997_v32, %v807_v4  ;;  %v3998_v47 = vrot.slane %v3251_v51, %v2703_v39  ;;  %v753_v49 = vmul.f32 %v746_v0, %v3182_v14 }
 0x324   :  { %v754_v4 = vmul.f32 %v750_v59, %v3182_v14  ;;  %v781_v33 = vrot.slane %v666_v25, %v2712_v42  ;;  %v752_v45 = vmul.f32 %v742_v56, %v3182_v14  ;;  %v802_v3 = vsel %vm799_vm10, %v798_v26, %v3319_v31 }
 0x325   :  { %v3440_v9 = vmul.f32 %v3998_v47, %v800_v19  ;;  %v845_v48 = vrot.slane %v3433_v57, %v2696_v37  ;;  %v3999_v16 = vrot.slane %v3251_v51, %v2710_v41  ;;  %v757_v59 = vadd.f32 %v753_v49, %v726_v15 }
 0x326   :  { %v758_v19 = vadd.f32 %v754_v4, %v727_v20  ;;  %v3463_v58 = vpop.permute.xlu1 %964  ;;  %v1783_v14 = vrot.slane %v3445_v53, %v2696_v37  ;;  %v786_v56 = vadd.f32 %v782_v13, %v755_v18  ;;  %v756_v28 = vadd.f32 %v752_v45, %v725_v60 }
 0x327   :  { %v849_v2 = vrot.slane %v3440_v9, %v2696_v37  ;;  %v3460_v0 = vmul.f32 %v3999_v16, %v801_v43  ;;  %v858_v25 = vmul.f32 %v845_v48, %v3140_v24  ;;  %v876_v22 = vrot.slane %v3433_v57, %v2703_v39 }
 0x328   :  { %v1787_v26 = vrot.slane %v3445_v53, %v2703_v39  ;;  %v783_v31 = vmul.f32 %v773_v52, %v3195_v54  ;;  %v784_v15 = vmul.f32 %v777_v44, %v3195_v54  ;;  %v785_v20 = vmul.f32 %v781_v33, %v3195_v54 }
 0x329   :  { %v4000_v32 = vrot.slane %v3251_v51, %v2712_v42  ;;  %v859_v13 = vmul.f32 %v849_v2, %v3140_v24  ;;  %v862_v18 = vadd.f32 %v858_v25, %v786_v56  ;;  %v880_v60 = vrot.slane %v3440_v9, %v2703_v39 }
 0x32a   :  { %v853_v47 = vrot.slane %v3460_v0, %v2696_v37  ;;  %v788_v49 = vadd.f32 %v784_v15, %v757_v59  ;;  %v789_v52 = vadd.f32 %v785_v20, %v758_v19  ;;  %v907_v44 = vrot.slane %v3433_v57, %v2710_v41  ;;  %v967_v16 = vpop.permute.xlu1 %966 }
 0x32b   :  { %v3477_v43 = vmul.f32 %v4000_v32, %v802_v3  ;;  %v787_v51 = vadd.f32 %v783_v31, %v756_v28  ;;  %v889_v4 = vmul.f32 %v876_v22, %v3149_v35  ;;  %v884_v33 = vrot.slane %v3460_v0, %v2703_v39 }
 0x32c   :  { %v1791_v48 = vrot.slane %v3445_v53, %v2710_v41  ;;  %v860_v45 = vmul.f32 %v853_v47, %v3140_v24  ;;  %v890_v25 = vmul.f32 %v880_v60, %v3149_v35  ;;  %v911_v28 = vrot.slane %v3440_v9, %v2710_v41  ;;  %v3517_v47 = vld [vmem:[%s3966_s14 + $0x20] sm:$0xf] }
 0x32d   :  { %v857_v54 = vrot.slane %v3477_v43, %v2696_v37  ;;  %v888_v3 = vrot.slane %v3477_v43, %v2703_v39  ;;  %v863_v19 = vadd.f32 %v859_v13, %v787_v51  ;;  %v893_v56 = vadd.f32 %v889_v4, %v862_v18 }
 0x32e   :  { %v920_v31 = vmul.f32 %v907_v44, %v3152_v10  ;;  %v864_v15 = vadd.f32 %v860_v45, %v788_v49  ;;  %v942_v32 = vrot.slane %v3440_v9, %v2712_v42  ;;  %v891_v13 = vmul.f32 %v884_v33, %v3149_v35 }
 0x32f   :  { %v861_v2 = vmul.f32 %v857_v54, %v3140_v24  ;;  %v3502_v22 = vpop.permute.xlu0 %1639  ;;  %v938_v24 = vrot.slane %v3433_v57, %v2712_v42  ;;  %v915_v18 = vrot.slane %v3460_v0, %v2710_v41  ;;  %v970_v60 = vsel %vm968_vm11, %v3463_v58, %v967_v16 }
 0x330   :  { %v892_v57 = vmul.f32 %v888_v3, %v3149_v35  ;;  %v919_v49 = vrot.slane %v3477_v43, %v2710_v41  ;;  %v971_v9 = vsel %vm968_vm11, %v967_v16, %v3422_v11  ;;  %v894_v54 = vadd.f32 %v890_v25, %v863_v19 }
 0x331   :  { %v865_v20 = vadd.f32 %v861_v2, %v789_v52  ;;  %v4001_v52 = vrot.slane %v3284_v29, %v2710_v41  ;;  %v924_v51 = vadd.f32 %v920_v31, %v893_v56  ;;  %v946_v4 = vrot.slane %v3460_v0, %v2712_v42 }
 0x332   :  { %v4002_v33 = vrot.slane %v3284_v29, %v2712_v42  ;;  %v895_v2 = vadd.f32 %v891_v13, %v864_v15  ;;  %v921_v19 = vmul.f32 %v911_v28, %v3152_v10  ;;  %v951_v25 = vmul.f32 %v938_v24, %v3200_v36 }
 0x333   :  { %v3527_v44 = vmul.f32 %v4001_v52, %v970_v60  ;;  %v963_v45 = vpop.permute.xlu0 %962  ;;  %v896_v3 = vadd.f32 %v892_v57, %v865_v20  ;;  %v950_v0 = vrot.slane %v3477_v43, %v2712_v42  ;;  %v922_v31 = vmul.f32 %v915_v18, %v3152_v10 }
 0x334   :  { %v3534_v35 = vmul.f32 %v4002_v33, %v971_v9  ;;  %v923_v15 = vmul.f32 %v919_v49, %v3152_v10  ;;  %v925_v28 = vadd.f32 %v921_v19, %v894_v54  ;;  %v952_v24 = vmul.f32 %v942_v32, %v3200_v36  ;;  %v3575_v19 = vpop.permute.xlu1 %1128 }
 0x335   :  { %v1022_v20 = vrot.slane %v3527_v44, %v2696_v37  ;;  %v955_v57 = vadd.f32 %v951_v25, %v924_v51  ;;  %v953_v43 = vmul.f32 %v946_v4, %v3200_v36  ;;  %v926_v52 = vadd.f32 %v922_v31, %v895_v2 }
 0x336   :  { %v1026_v13 = vrot.slane %v3534_v35, %v2696_v37  ;;  %v927_v33 = vadd.f32 %v923_v15, %v896_v3  ;;  %v969_v18 = vsel %vm968_vm11, %v963_v45, %v3463_v58  ;;  %v976_v10 = vsel %vm968_vm11, %v3422_v11, %v963_v45 }
 0x337   :  { %v3554_v9 = vpop.permute.xlu0 %1670  ;;  %v954_v49 = vmul.f32 %v950_v0, %v3200_v36  ;;  %v1053_v54 = vrot.slane %v3527_v44, %v2703_v39  ;;  %v4003_v32 = vrot.slane %v3284_v29, %v2696_v37  ;;  %v4004_v4 = vrot.slane %v3284_v29, %v2703_v39 }
 0x338   :  { %v1029_v3 = vmul.f32 %v1022_v20, %v3162_v7  ;;  %v1030_v58 = vmul.f32 %v1026_v13, %v3162_v7  ;;  %v1057_v11 = vrot.slane %v3534_v35, %v2703_v39  ;;  %v1084_v36 = vrot.slane %v3527_v44, %v2710_v41 }
 0x339   :  { %v1000_v51 = vmul.f32 %v4003_v32, %v976_v10  ;;  %v1001_v2 = vmul.f32 %v4004_v4, %v969_v18  ;;  %v956_v45 = vadd.f32 %v952_v24, %v925_v28  ;;  %v957_v15 = vadd.f32 %v953_v43, %v926_v52 }
 0x33a   :  { %v958_v20 = vadd.f32 %v954_v49, %v927_v33  ;;  %v1088_v13 = vrot.slane %v3534_v35, %v2710_v41  ;;  %v1060_v10 = vmul.f32 %v1053_v54, %v3169_v46  ;;  %v1061_v60 = vmul.f32 %v1057_v11, %v3169_v46 }
 0x33b   :  { %v1014_v25 = vrot.slane %v1000_v51, %v2696_v37  ;;  %v1018_v0 = vrot.slane %v1001_v2, %v2696_v37  ;;  %v1045_v29 = vrot.slane %v1000_v51, %v2703_v39  ;;  %v1132_v31 = vpop.permute.xlu0 %1131  ;;  %v1049_v18 = vrot.slane %v1001_v2, %v2703_v39 }
 0x33c   :  { %v1076_v32 = vrot.slane %v1000_v51, %v2710_v41  ;;  %v1033_v4 = vadd.f32 %v1029_v3, %v957_v15  ;;  %v1034_v56 = vadd.f32 %v1030_v58, %v958_v20  ;;  %v1091_v43 = vmul.f32 %v1084_v36, %v3179_v30 }
 0x33d   :  { %v1027_v28 = vmul.f32 %v1014_v25, %v3162_v7  ;;  %v1028_v24 = vmul.f32 %v1018_v0, %v3162_v7  ;;  %v1058_v49 = vmul.f32 %v1045_v29, %v3169_v46  ;;  %v1107_v16 = vrot.slane %v1000_v51, %v2712_v42 }
 0x33e   :  { %v1115_v7 = vrot.slane %v3527_v44, %v2712_v42  ;;  %v1059_v3 = vmul.f32 %v1049_v18, %v3169_v46  ;;  %v1080_v58 = vrot.slane %v1001_v2, %v2710_v41  ;;  %v1145_v11 = vsel %vm1137_vm12, %v3575_v19, %v1132_v31 }
 0x33f   :  { %v1031_v52 = vadd.f32 %v1027_v28, %v955_v57  ;;  %v1032_v33 = vadd.f32 %v1028_v24, %v956_v45  ;;  %v3591_v59 = vpop.permute.xlu0 %1701  ;;  %v3593_v54 = vpop.permute.xlu1 %1732  ;;  %v1119_v57 = vrot.slane %v3534_v35, %v2712_v42  ;;  %v1089_v51 = vmul.f32 %v1076_v32, %v3179_v30 }
 0x340   :  { %v4005_v45 = vrot.slane %v3308_v50, %v2696_v37  ;;  %v1064_v0 = vadd.f32 %v1060_v10, %v1033_v4  ;;  %v1065_v29 = vadd.f32 %v1061_v60, %v1034_v56  ;;  %v1111_v46 = vrot.slane %v1001_v2, %v2712_v42 }
 0x341   :  { %v1062_v36 = vadd.f32 %v1058_v49, %v1031_v52  ;;  %v1063_v44 = vadd.f32 %v1059_v3, %v1032_v33  ;;  %v1120_v20 = vmul.f32 %v1107_v16, %v3206_v55  ;;  %v1092_v32 = vmul.f32 %v1088_v13, %v3179_v30 }
 0x342   :  { %v1169_v25 = vmul.f32 %v4005_v45, %v1145_v11  ;;  %v1122_v52 = vmul.f32 %v1115_v7, %v3206_v55  ;;  %v1090_v10 = vmul.f32 %v1080_v58, %v3179_v30  ;;  %v1123_v56 = vmul.f32 %v1119_v57, %v3206_v55 }
 0x343   :  { %v1093_v15 = vadd.f32 %v1089_v51, %v1062_v36  ;;  %v3611_v35 = vpop.permute.xlu0 %1808  ;;  %v1134_v24 = vpop.permute.xlu1 %1133  ;;  %v1095_v33 = vadd.f32 %v1091_v43, %v1064_v0  ;;  %v1096_v49 = vadd.f32 %v1092_v32, %v1065_v29  ;;  %v4006_v13 = vrot.slane %v3308_v50, %v2703_v39 }
 0x344   :  { %v1183_v18 = vrot.slane %v1169_v25, %v2696_v37  ;;  %v1214_v28 = vrot.slane %v1169_v25, %v2703_v39  ;;  %v1138_v60 = vsel %vm1137_vm12, %v1132_v31, %v1134_v24  ;;  %v1245_v4 = vrot.slane %v1169_v25, %v2710_v41 }
 0x345   :  { %v1124_v2 = vadd.f32 %v1120_v20, %v1093_v15  ;;  %v1094_v3 = vadd.f32 %v1090_v10, %v1063_v44  ;;  %v1170_v11 = vmul.f32 %v4006_v13, %v1138_v60  ;;  %v1121_v7 = vmul.f32 %v1111_v46, %v3206_v55 }
 0x346   :  { %v1196_v16 = vmul.f32 %v1183_v18, %v3184_v8  ;;  %v1227_v31 = vmul.f32 %v1214_v28, %v3197_v62  ;;  %v1276_v58 = vrot.slane %v1169_v25, %v2712_v42  ;;  %v1258_v44 = vmul.f32 %v1245_v4, %v3202_v5 }
 0x347   :  { %v3626_v57 = vpop.permute.xlu0 %1839  ;;  %v1136_v36 = vpop.permute.xlu1 %1135  ;;  %v1187_v51 = vrot.slane %v1170_v11, %v2696_v37  ;;  %v1218_v43 = vrot.slane %v1170_v11, %v2703_v39  ;;  %v1249_v45 = vrot.slane %v1170_v11, %v2710_v41  ;;  %v1280_v0 = vrot.slane %v1170_v11, %v2712_v42 }
 0x348   :  { %v1200_v30 = vadd.f32 %v1196_v16, %v1124_v2  ;;  %v1139_v55 = vsel %vm1137_vm12, %v1134_v24, %v1136_v36  ;;  %v1140_v46 = vsel %vm1137_vm12, %v1136_v36, %v3575_v19  ;;  %v1126_v25 = vadd.f32 %v1122_v52, %v1095_v33 }
 0x349   :  { %v1127_v15 = vadd.f32 %v1123_v56, %v1096_v49  ;;  %v1125_v20 = vadd.f32 %v1121_v7, %v1094_v3  ;;  %v1197_v18 = vmul.f32 %v1187_v51, %v3184_v8  ;;  %v1289_v32 = vmul.f32 %v1276_v58, %v3211_v17 }
 0x34a   :  { %v1231_v29 = vadd.f32 %v1227_v31, %v1200_v30  ;;  %v4007_v10 = vrot.slane %v3308_v50, %v2710_v41  ;;  %v4008_v2 = vrot.slane %v3308_v50, %v2712_v42  ;;  %v1228_v19 = vmul.f32 %v1218_v43, %v3197_v62 }
 0x34b   :  { %v3644_v24 = vpop.permute.xlu1 %1421  ;;  %v1201_v4 = vadd.f32 %v1197_v18, %v1125_v20  ;;  %v1259_v52 = vmul.f32 %v1249_v45, %v3202_v5  ;;  %v1290_v56 = vmul.f32 %v1280_v0, %v3211_v17  ;;  %v1424_v33 = vpop.permute.xlu0 %1423 }
 0x34c   :  { %v1262_v28 = vadd.f32 %v1258_v44, %v1231_v29  ;;  %v1171_v60 = vmul.f32 %v4007_v10, %v1139_v55  ;;  %v1172_v16 = vmul.f32 %v4008_v2, %v1140_v46  ;;  %v1430_v43 = vsel %vm1429_vm13, %v3644_v24, %v1424_v33 }
 0x34d   :  { %v1232_v7 = vadd.f32 %v1228_v19, %v1201_v4  ;;  %v4009_v10 = vrot.slane %v3338_v1, %v2696_v37 }
 0x34e   :  { %v1293_v49 = vadd.f32 %v1289_v32, %v1262_v28  ;;  %v1191_v3 = vrot.slane %v1171_v60, %v2696_v37  ;;  %v1195_v13 = vrot.slane %v1172_v16, %v2696_v37  ;;  %v1222_v11 = vrot.slane %v1171_v60, %v2703_v39 }
 0x34f   :  { %v1226_v50 = vrot.slane %v1172_v16, %v2703_v39  ;;  %v1253_v30 = vrot.slane %v1171_v60, %v2710_v41  ;;  %v1257_v31 = vrot.slane %v1172_v16, %v2710_v41  ;;  %v3660_v45 = vpop.permute.xlu1 %1901  ;;  %v1263_v0 = vadd.f32 %v1259_v52, %v1232_v7 }
 0x350   :  { %v1324_v58 = vadd.f32 %v3317_v12, %v1293_v49  ;;  %v1198_v36 = vmul.f32 %v1191_v3, %v3184_v8  ;;  %v1199_v51 = vmul.f32 %v1195_v13, %v3184_v8  ;;  %v1229_v29 = vmul.f32 %v1222_v11, %v3197_v62 }
 0x351   :  { %v1230_v44 = vmul.f32 %v1226_v50, %v3197_v62  ;;  %v1260_v55 = vmul.f32 %v1253_v30, %v3202_v5  ;;  %v1284_v18 = vrot.slane %v1171_v60, %v2712_v42  ;;  %v1294_v28 = vadd.f32 %v1290_v56, %v1263_v0  ;;  %v4011_v0 = vld [vmem:[#allocation11_spill] sm:$0xff] }
 0x352   :  { %v1355_v46 = vadd.f32 %v3286_v38, %v1324_v58  ;;  %v1202_v20 = vadd.f32 %v1198_v36, %v1126_v25  ;;  %v1203_v12 = vadd.f32 %v1199_v51, %v1127_v15  ;;  %v1261_v8 = vmul.f32 %v1257_v31, %v3202_v5  ;;  %v3688_v36 = vpop.permute.xlu0 %1870 }
 0x353   :  { %v1288_v32 = vrot.slane %v1172_v16, %v2712_v42  ;;  %v1462_v2 = vmul.f32 %v4009_v10, %v1430_v43  ;;  %v1291_v62 = vmul.f32 %v1284_v18, %v3211_v17  ;;  %v1426_v38 = vpop.permute.xlu1 %1425  ;;  %v1325_v25 = vadd.f32 %v3328_v27, %v1294_v28  ;;  %v4015_v10 = vld [vmem:[#allocation7_spill] sm:$0xff] }
 0x354   :  { %v1233_v4 = vadd.f32 %v1229_v29, %v1202_v20  ;;  %v1234_v19 = vadd.f32 %v1230_v44, %v1203_v12  ;;  %v1386_v52 = vadd.f32 %v3347_v23, %v1355_v46  ;;  %v1964_v27 = vrot.slane %v3517_v47, %v2712_v42  ;;  %v4012_v44 = vld [vmem:[#allocation12_spill] sm:$0xff] }
 0x355   :  { %v1292_v15 = vmul.f32 %v1288_v32, %v3211_v17  ;;  %v1476_v60 = vrot.slane %v1462_v2, %v2696_v37  ;;  %v1507_v5 = vrot.slane %v1462_v2, %v2703_v39  ;;  %v1538_v3 = vrot.slane %v1462_v2, %v2710_v41  ;;  %v4013_v12 = vld [vmem:[#allocation8_spill] sm:$0xff] }
 0x356   :  { %v1264_v16 = vadd.f32 %v1260_v55, %v1233_v4  ;;  %v1265_v56 = vadd.f32 %v1261_v8, %v1234_v19  ;;  %v1417_v49 = vadd.f32 %v3301_v63, %v1386_v52  ;;  %v1356_v13 = vadd.f32 %v3289_v6, %v1325_v25  ;;  %v4014_v8 = vld [vmem:[#allocation6_spill] sm:$0xff] }
 0x357   :  { %v1489_v11 = vmul.f32 %v1476_v60, %v3219_v40  ;;  %v1520_v23 = vmul.f32 %v1507_v5, %v3221_v21  ;;  %v1569_v50 = vrot.slane %v1462_v2, %v2712_v42  ;;  %v1431_v30 = vsel %vm1429_vm13, %v1424_v33, %v1426_v38  ;;  %v1428_v31 = vpop.permute.xlu1 %1427 }
 0x358   :  { %v1295_v17 = vadd.f32 %v1291_v62, %v1264_v16  ;;  %v1296_v7 = vadd.f32 %v1292_v15, %v1265_v56  ;;  %v1551_v63 = vmul.f32 %v1538_v3, %v3240_v34  ;;  %v1387_v6 = vadd.f32 %v3352_v61, %v1356_v13  ;;  %v4018_v56 = vld [vmem:[#allocation13_spill] sm:$0xff]  ;;  %v4019_v3 = vld [vmem:[#allocation14_spill] sm:$0xff] }
 0x359   :  { %v1493_v58 = vadd.f32 %v1489_v11, %v1417_v49  ;;  %v4010_v51 = vrot.slane %v3338_v1, %v2703_v39  ;;  %v1432_v46 = vsel %vm1429_vm13, %v1426_v38, %v1428_v31  ;;  %v1438_v33 = vsel %vm1429_vm13, %v1428_v31, %v3644_v24  ;;  %v4016_v38 = vld [vmem:[#allocation5_spill] sm:$0xff]  ;;  %v1593_v11 = vpop.permute.xlu0 %1592 }
 0x35a   :  { %v1326_v29 = vadd.f32 %v4011_v0, %v1295_v17  ;;  %v1327_v55 = vadd.f32 %v4012_v44, %v1296_v7  ;;  %v1418_v18 = vadd.f32 %v4013_v12, %v1387_v6  ;;  %v1582_v25 = vmul.f32 %v1569_v50, %v4016_v38  ;;  %v4021_v31 = vld [vmem:[#allocation9_spill] sm:$0xff] }
 0x35b   :  { %v1463_v43 = vmul.f32 %v4010_v51, %v1431_v30  ;;  %v1524_v20 = vadd.f32 %v1520_v23, %v1493_v58  ;;  %v1591_v62 = vpop.permute.xlu1 %1590  ;;  %v4017_v15 = vrot.slane %v3338_v1, %v2710_v41  ;;  %v4020_v7 = vrot.slane %v3338_v1, %v2712_v42 }
 0x35c   :  { %v1357_v32 = vadd.f32 %v4014_v8, %v1326_v29  ;;  %v1358_v2 = vadd.f32 %v4015_v10, %v1327_v55 }
 0x35d   :  { %v1480_v28 = vrot.slane %v1463_v43, %v2696_v37  ;;  %v1511_v61 = vrot.slane %v1463_v43, %v2703_v39  ;;  %v1542_v4 = vrot.slane %v1463_v43, %v2710_v41  ;;  %v1573_v19 = vrot.slane %v1463_v43, %v2712_v42 }
 0x35e   :  { %v1555_v52 = vadd.f32 %v1551_v63, %v1524_v20  ;;  %v1464_v60 = vmul.f32 %v4017_v15, %v1432_v46  ;;  %v1388_v49 = vadd.f32 %v4018_v56, %v1357_v32  ;;  %v1389_v13 = vadd.f32 %v4019_v3, %v1358_v2  ;;  %v4022_v63 = vld [vmem:[#allocation10_spill] sm:$0xff] }
 0x35f   :  { %v1490_v24 = vmul.f32 %v1480_v28, %v3219_v40  ;;  %v1521_v5 = vmul.f32 %v1511_v61, %v3221_v21  ;;  %v1552_v16 = vmul.f32 %v1542_v4, %v3240_v34  ;;  %v1583_v17 = vmul.f32 %v1573_v19, %v4016_v38  ;;  %v1595_v0 = vpop.permute.xlu1 %1594 }
 0x360   :  { %v1465_v50 = vmul.f32 %v4020_v7, %v1438_v33  ;;  %v1484_v30 = vrot.slane %v1464_v60, %v2696_v37  ;;  %v1419_v58 = vadd.f32 %v4021_v31, %v1388_v49  ;;  %v1420_v6 = vadd.f32 %v4022_v63, %v1389_v13 }
 0x361   :  { %v1494_v23 = vadd.f32 %v1490_v24, %v1418_v18  ;;  %v1515_v51 = vrot.slane %v1464_v60, %v2703_v39  ;;  %v1546_v43 = vrot.slane %v1464_v60, %v2710_v41  ;;  %v1586_v1 = vadd.f32 %v1582_v25, %v1555_v52  ;;  %v3736_v52 = vpop.permute.xlu0 %1977 }
 0x362   :  { %v1488_v44 = vrot.slane %v1465_v50, %v2696_v37  ;;  %v1491_v55 = vmul.f32 %v1484_v30, %v3219_v40  ;;  %v1519_v46 = vrot.slane %v1465_v50, %v2703_v39  ;;  %v1550_v20 = vrot.slane %v1465_v50, %v2710_v41 }
 0x363   :  { %v1525_v29 = vadd.f32 %v1521_v5, %v1494_v23  ;;  %v1522_v33 = vmul.f32 %v1515_v51, %v3221_v21  ;;  %v1577_v12 = vrot.slane %v1464_v60, %v2712_v42  ;;  %v1553_v8 = vmul.f32 %v1546_v43, %v3240_v34  ;;  %v1597_v19 = vpop.permute.xlu1 %1596  ;;  %v4023_v60 = vld [vmem:[#allocation15_spill] sm:$0xff] }
 0x364   :  { %v1492_v28 = vmul.f32 %v1488_v44, %v3219_v40  ;;  %v1495_v61 = vadd.f32 %v1491_v55, %v1419_v58  ;;  %v1523_v32 = vmul.f32 %v1519_v46, %v3221_v21  ;;  %v1554_v10 = vmul.f32 %v1550_v20, %v3240_v34 }
 0x365   :  { %v1556_v18 = vadd.f32 %v1552_v16, %v1525_v29  ;;  %v1581_v2 = vrot.slane %v1465_v50, %v2712_v42  ;;  %v1599_v4 = vsel %vm1598_vm14, %v1591_v62, %v1593_v11  ;;  %v1584_v15 = vmul.f32 %v1577_v12, %v4016_v38  ;;  %v1762_v55 = vpop.permute.xlu0 %1761 }
 0x366   :  { %v1496_v25 = vadd.f32 %v1492_v28, %v1420_v6  ;;  %v1526_v24 = vadd.f32 %v1522_v33, %v1495_v61  ;;  %v4024_v40 = vrot.slane %v4023_v60, %v2696_v37  ;;  %v1600_v34 = vsel %vm1598_vm14, %v1593_v11, %v1595_v0 }
 0x367   :  { %v1587_v16 = vadd.f32 %v1583_v17, %v1556_v18  ;;  %v1585_v21 = vmul.f32 %v1581_v2, %v4016_v38  ;;  %v1601_v56 = vsel %vm1598_vm14, %v1595_v0, %v1597_v19  ;;  %v4025_v30 = vrot.slane %v4023_v60, %v2703_v39  ;;  %v1760_v31 = vpop.permute.xlu1 %1759 }
 0x368   :  { %v1631_v5 = vmul.f32 %v4024_v40, %v1599_v4  ;;  %v1527_v49 = vadd.f32 %v1523_v32, %v1496_v25  ;;  %v1557_v3 = vadd.f32 %v1553_v8, %v1526_v24  ;;  %v4026_v38 = vrot.slane %v4023_v60, %v2710_v41 }
 0x369   :  { %v1632_v17 = vmul.f32 %v4025_v30, %v1600_v34  ;;  %v1607_v51 = vsel %vm1598_vm14, %v1597_v19, %v1591_v62  ;;  %v4027_v62 = vrot.slane %v4023_v60, %v2712_v42 }
 0x36a   :  { %v1645_v13 = vrot.slane %v1631_v5, %v2696_v37  ;;  %v1676_v23 = vrot.slane %v1631_v5, %v2703_v39  ;;  %v1707_v7 = vrot.slane %v1631_v5, %v2710_v41  ;;  %v1738_v50 = vrot.slane %v1631_v5, %v2712_v42 }
 0x36b   :  { %v1633_v11 = vmul.f32 %v4026_v38, %v1601_v56  ;;  %v1558_v58 = vadd.f32 %v1554_v10, %v1527_v49  ;;  %v1588_v63 = vadd.f32 %v1584_v15, %v1557_v3  ;;  %v1649_v29 = vrot.slane %v1632_v17, %v2696_v37  ;;  %v1764_v32 = vpop.permute.xlu1 %1763 }
 0x36c   :  { %v1658_v6 = vmul.f32 %v1645_v13, %v3502_v22  ;;  %v1689_v43 = vmul.f32 %v1676_v23, %v3554_v9  ;;  %v1720_v0 = vmul.f32 %v1707_v7, %v3591_v59  ;;  %v1680_v44 = vrot.slane %v1632_v17, %v2703_v39  ;;  %v3780_v23 = vpop.permute.xlu0 %2008 }
 0x36d   :  { %v1751_v33 = vmul.f32 %v1738_v50, %v3593_v54  ;;  %v1711_v20 = vrot.slane %v1632_v17, %v2710_v41  ;;  %v1742_v12 = vrot.slane %v1632_v17, %v2712_v42  ;;  %v1589_v18 = vadd.f32 %v1585_v21, %v1558_v58 }
 0x36e   :  { %v1662_v46 = vadd.f32 %v1658_v6, %v1586_v1  ;;  %v1659_v28 = vmul.f32 %v1649_v29, %v3502_v22  ;;  %v1634_v61 = vmul.f32 %v4027_v62, %v1607_v51  ;;  %v1653_v8 = vrot.slane %v1633_v11, %v2696_v37 }
 0x36f   :  { %v1690_v2 = vmul.f32 %v1680_v44, %v3554_v9  ;;  %v1721_v1 = vmul.f32 %v1711_v20, %v3591_v59  ;;  %v1684_v4 = vrot.slane %v1633_v11, %v2703_v39  ;;  %v1752_v40 = vmul.f32 %v1742_v12, %v3593_v54 }
 0x370   :  { %v1693_v10 = vadd.f32 %v1689_v43, %v1662_v46  ;;  %v1663_v19 = vadd.f32 %v1659_v28, %v1587_v16  ;;  %v1657_v25 = vrot.slane %v1634_v61, %v2696_v37  ;;  %v1660_v24 = vmul.f32 %v1653_v8, %v3502_v22  ;;  %v1766_v16 = vpop.permute.xlu1 %1765  ;;  %v1931_v62 = vpop.permute.xlu0 %1930 }
 0x371   :  { %v1688_v15 = vrot.slane %v1634_v61, %v2703_v39  ;;  %v1715_v5 = vrot.slane %v1633_v11, %v2710_v41  ;;  %v1719_v21 = vrot.slane %v1634_v61, %v2710_v41  ;;  %v1691_v3 = vmul.f32 %v1684_v4, %v3554_v9 }
 0x372   :  { %v1724_v60 = vadd.f32 %v1720_v0, %v1693_v10  ;;  %v1694_v34 = vadd.f32 %v1690_v2, %v1663_v19  ;;  %v1661_v56 = vmul.f32 %v1657_v25, %v3502_v22  ;;  %v1664_v49 = vadd.f32 %v1660_v24, %v1588_v63 }
 0x373   :  { %v1692_v7 = vmul.f32 %v1688_v15, %v3554_v9  ;;  %v1722_v50 = vmul.f32 %v1715_v5, %v3591_v59  ;;  %v1746_v30 = vrot.slane %v1633_v11, %v2712_v42  ;;  %v1750_v6 = vrot.slane %v1634_v61, %v2712_v42 }
 0x374   :  { %v1755_v13 = vadd.f32 %v1751_v33, %v1724_v60  ;;  %v1725_v17 = vadd.f32 %v1721_v1, %v1694_v34  ;;  %v1665_v38 = vadd.f32 %v1661_v56, %v1589_v18  ;;  %v1695_v58 = vadd.f32 %v1691_v3, %v1664_v49 }
 0x375   :  { %v1723_v22 = vmul.f32 %v1719_v21, %v3591_v59  ;;  %v1768_v63 = vsel %vm1767_vm15, %v1760_v31, %v1762_v55  ;;  %v1769_v51 = vsel %vm1767_vm15, %v1762_v55, %v1764_v32  ;;  %v1770_v43 = vsel %vm1767_vm15, %v1764_v32, %v1766_v16  ;;  %v3799_v55 = vpop.permute.xlu1 %1928 }
 0x376   :  { %v1756_v0 = vadd.f32 %v1752_v40, %v1725_v17  ;;  %v1696_v29 = vadd.f32 %v1692_v7, %v1665_v38  ;;  %v1726_v9 = vadd.f32 %v1722_v50, %v1695_v58  ;;  %v1753_v44 = vmul.f32 %v1746_v30, %v3593_v54 }
 0x377   :  { %v1754_v11 = vmul.f32 %v1750_v6, %v3593_v54  ;;  %v1800_v46 = vmul.f32 %v1783_v14, %v1768_v63  ;;  %v1801_v59 = vmul.f32 %v1787_v26, %v1769_v51  ;;  %v1776_v33 = vsel %vm1767_vm15, %v1766_v16, %v1760_v31 }
 0x378   :  { %v1727_v20 = vadd.f32 %v1723_v22, %v1696_v29  ;;  %v1757_v12 = vadd.f32 %v1753_v44, %v1726_v9  ;;  %v1802_v18 = vmul.f32 %v1791_v48, %v1770_v43  ;;  %v4028_v54 = vrot.slane %v3445_v53, %v2712_v42 }
 0x379   :  { %v1814_v14 = vrot.slane %v1800_v46, %v2696_v37  ;;  %v1845_v61 = vrot.slane %v1800_v46, %v2703_v39  ;;  %v1876_v26 = vrot.slane %v1800_v46, %v2710_v41  ;;  %v1907_v31 = vrot.slane %v1800_v46, %v2712_v42  ;;  %v1933_v34 = vpop.permute.xlu1 %1932 }
 0x37a   :  { %v1803_v28 = vmul.f32 %v4028_v54, %v1776_v33  ;;  %v1818_v8 = vrot.slane %v1801_v59, %v2696_v37  ;;  %v1849_v32 = vrot.slane %v1801_v59, %v2703_v39  ;;  %v1880_v10 = vrot.slane %v1801_v59, %v2710_v41 }
 0x37b   :  { %v1937_v48 = vsel %vm1936_vm0, %v3799_v55, %v1931_v62  ;;  %v1758_v53 = vadd.f32 %v1754_v11, %v1727_v20  ;;  %v1827_v2 = vmul.f32 %v1814_v14, %v3611_v35  ;;  %v1858_v1 = vmul.f32 %v1845_v61, %v3626_v57 }
 0x37c   :  { %v1889_v4 = vmul.f32 %v1876_v26, %v3688_v36  ;;  %v1920_v19 = vmul.f32 %v1907_v31, %v3660_v45  ;;  %v1828_v25 = vmul.f32 %v1818_v8, %v3611_v35  ;;  %v1859_v24 = vmul.f32 %v1849_v32, %v3626_v57 }
 0x37d   :  { %v1911_v15 = vrot.slane %v1801_v59, %v2712_v42  ;;  %v1831_v60 = vadd.f32 %v1827_v2, %v1755_v13  ;;  %v1822_v40 = vrot.slane %v1802_v18, %v2696_v37  ;;  %v1826_v5 = vrot.slane %v1803_v28, %v2696_v37  ;;  %v1935_v33 = vpop.permute.xlu1 %1934 }
 0x37e   :  { %v1853_v21 = vrot.slane %v1802_v18, %v2703_v39  ;;  %v1832_v56 = vadd.f32 %v1828_v25, %v1756_v0  ;;  %v1890_v49 = vmul.f32 %v1880_v10, %v3688_v36  ;;  %v1857_v3 = vrot.slane %v1803_v28, %v2703_v39 }
 0x37f   :  { %v1884_v16 = vrot.slane %v1802_v18, %v2710_v41  ;;  %v1862_v7 = vadd.f32 %v1858_v1, %v1831_v60  ;;  %v1921_v50 = vmul.f32 %v1911_v15, %v3660_v45  ;;  %v1829_v30 = vmul.f32 %v1822_v40, %v3611_v35 }
 0x380   :  { %v1830_v13 = vmul.f32 %v1826_v5, %v3611_v35  ;;  %v1863_v17 = vadd.f32 %v1859_v24, %v1832_v56  ;;  %v1860_v38 = vmul.f32 %v1853_v21, %v3626_v57  ;;  %v1861_v58 = vmul.f32 %v1857_v3, %v3626_v57  ;;  %v2040_v56 = vpop.permute.xlu0 %2039 }
 0x381   :  { %v1888_v6 = vrot.slane %v1803_v28, %v2710_v41  ;;  %v1893_v22 = vadd.f32 %v1889_v4, %v1862_v7  ;;  %v1833_v63 = vadd.f32 %v1829_v30, %v1757_v12  ;;  %v1915_v43 = vrot.slane %v1802_v18, %v2712_v42 }
 0x382   :  { %v1834_v51 = vadd.f32 %v1830_v13, %v1758_v53  ;;  %v1894_v0 = vadd.f32 %v1890_v49, %v1863_v17  ;;  %v1891_v29 = vmul.f32 %v1884_v16, %v3688_v36  ;;  %v1919_v9 = vrot.slane %v1803_v28, %v2712_v42 }
 0x383   :  { %v4029_v35 = vrot.slane %v3517_v47, %v2696_v37  ;;  %v1924_v11 = vadd.f32 %v1920_v19, %v1893_v22  ;;  %v1864_v46 = vadd.f32 %v1860_v38, %v1833_v63  ;;  %v1892_v57 = vmul.f32 %v1888_v6, %v3688_v36  ;;  %v2071_v6 = vpop.permute.xlu1 %2070 }
 0x384   :  { %v1865_v59 = vadd.f32 %v1861_v58, %v1834_v51  ;;  %v1925_v20 = vadd.f32 %v1921_v50, %v1894_v0  ;;  %v1922_v12 = vmul.f32 %v1915_v43, %v3660_v45  ;;  %v1923_v28 = vmul.f32 %v1919_v9, %v3660_v45 }
 0x385   :  { %v1969_v44 = vmul.f32 %v4029_v35, %v1937_v48  ;;  %v1895_v14 = vadd.f32 %v1891_v29, %v1864_v46  ;;  %v1938_v26 = vsel %vm1936_vm0, %v1931_v62, %v1933_v34  ;;  %v4030_v36 = vrot.slane %v3517_v47, %v2703_v39 }
 0x386   :  { %v1896_v61 = vadd.f32 %v1892_v57, %v1865_v59  ;;  %v1939_v10 = vsel %vm1936_vm0, %v1933_v34, %v1935_v33  ;;  %v1945_v2 = vsel %vm1936_vm0, %v1935_v33, %v3799_v55  ;;  %v4031_v45 = vrot.slane %v3517_v47, %v2710_v41 }
 0x387   :  { %v1983_v18 = vrot.slane %v1969_v44, %v2696_v37  ;;  %v2014_v54 = vrot.slane %v1969_v44, %v2703_v39  ;;  %v2045_v8 = vrot.slane %v1969_v44, %v2710_v41  ;;  %v1970_v32 = vmul.f32 %v4030_v36, %v1938_v26 }
 0x388   :  { %v1926_v48 = vadd.f32 %v1922_v12, %v1895_v14  ;;  %v1971_v62 = vmul.f32 %v4031_v45, %v1939_v10  ;;  %v1972_v25 = vmul.f32 %v1964_v27, %v1945_v2  ;;  %v1927_v40 = vadd.f32 %v1923_v28, %v1896_v61 }
 0x389   :  { %v1996_v31 = vmul.f32 %v1983_v18, %v3736_v52  ;;  %v2027_v53 = vmul.f32 %v2014_v54, %v3780_v23  ;;  %v1987_v1 = vrot.slane %v1970_v32, %v2696_v37  ;;  %v2018_v4 = vrot.slane %v1970_v32, %v2703_v39  ;;  %v2101_v54 = vpop.permute.xlu0 %2100 }
 0x38a   :  { %v2049_v19 = vrot.slane %v1970_v32, %v2710_v41  ;;  %v1991_v24 = vrot.slane %v1971_v62, %v2696_v37  ;;  %v2022_v15 = vrot.slane %v1971_v62, %v2703_v39  ;;  %v2053_v55 = vrot.slane %v1971_v62, %v2710_v41 }
 0x38b   :  { %v2000_v60 = vadd.f32 %v1996_v31, %v1924_v11  ;;  %v1997_v5 = vmul.f32 %v1987_v1, %v3736_v52  ;;  %v1995_v21 = vrot.slane %v1972_v25, %v2696_v37  ;;  %v2026_v34 = vrot.slane %v1972_v25, %v2703_v39  ;;  %v2162_v1 = vld [vmem:[%s3961_s9] sm:$0xf] }
 0x38c   :  { %v2028_v49 = vmul.f32 %v2018_v4, %v3780_v23  ;;  %v1998_v47 = vmul.f32 %v1991_v24, %v3736_v52  ;;  %v2029_v27 = vmul.f32 %v2022_v15, %v3780_v23  ;;  %v2057_v7 = vrot.slane %v1972_v25, %v2710_v41  ;;  %v2428_v4 = vld [vmem:[%s3961_s9 + $0x8] sm:$0xf] }
 0x38d   :  { %v2031_v3 = vadd.f32 %v2027_v53, %v2000_v60  ;;  %v1999_v16 = vmul.f32 %v1995_v21, %v3736_v52  ;;  %v2001_v50 = vadd.f32 %v1997_v5, %v1925_v20  ;;  %v2058_v30 = vmul.f32 %v2045_v8, %v2040_v56 }
 0x38e   :  { %v2030_v13 = vmul.f32 %v2026_v34, %v3780_v23  ;;  %v2002_v17 = vadd.f32 %v1998_v47, %v1926_v48  ;;  %v2059_v38 = vmul.f32 %v2049_v19, %v2040_v56  ;;  %v2060_v58 = vmul.f32 %v2053_v55, %v2040_v56  ;;  %v2285_v19 = vld [vmem:[%s3962_s10] sm:$0xf] }
 0x38f   :  { %v2003_v22 = vadd.f32 %v1999_v16, %v1927_v40  ;;  %v2032_v63 = vadd.f32 %v2028_v49, %v2001_v50  ;;  %v2062_v51 = vadd.f32 %v2058_v30, %v2031_v3  ;;  %v2076_v43 = vrot.slane %v1969_v44, %v2712_v42 }
 0x390   :  { %v2033_v0 = vadd.f32 %v2029_v27, %v2002_v17  ;;  %v2080_v29 = vrot.slane %v1970_v32, %v2712_v42  ;;  %v2084_v52 = vrot.slane %v1971_v62, %v2712_v42  ;;  %v2088_v9 = vrot.slane %v1972_v25, %v2712_v42  ;;  %v2108_v62 = vld [vmem:[%s3960_s8] sm:$0xf] }
 0x391   :  { %v2034_v35 = vadd.f32 %v2030_v13, %v2003_v22  ;;  %v2061_v11 = vmul.f32 %v2057_v7, %v2040_v56  ;;  %v2063_v46 = vadd.f32 %v2059_v38, %v2032_v63  ;;  %v2089_v23 = vmul.f32 %v2076_v43, %v2071_v6  ;;  %v2107_v38 = vld [vmem:[%s3959_s7] sm:$0xf]  ;;  %v2427_v22 = vld [vmem:[%s3961_s9 + $0x4] sm:$0xf]  ;;  %v2429_v63 = vld [vmem:[%s3961_s9 + $0xc] sm:$0xf] }
 0x392   :  { %v2064_v59 = vadd.f32 %v2060_v58, %v2033_v0  ;;  %v2090_v57 = vmul.f32 %v2080_v29, %v2071_v6  ;;  %v2091_v33 = vmul.f32 %v2084_v52, %v2071_v6  ;;  %v2092_v12 = vmul.f32 %v2088_v9, %v2071_v6 }
 0x393   :  { %v2065_v20 = vadd.f32 %v2061_v11, %v2034_v35  ;;  %v2093_v18 = vadd.f32 %v2089_v23, %v2062_v51 }
 0x394   :  { %v2094_v14 = vadd.f32 %v2090_v57, %v2063_v46  ;;  %v2095_v44 = vadd.f32 %v2091_v33, %v2064_v59 }
 0x395   :  { %v2096_v61 = vadd.f32 %v2092_v12, %v2065_v20  ;;  %v2103_v28 = vadd.f32 %v2101_v54, %v2093_v18 }
 0x396   :  { %v2104_v26 = vadd.f32 %v2101_v54, %v2094_v14  ;;  %v2105_v31 = vadd.f32 %v2101_v54, %v2095_v44 }
 0x397   :  { %v2106_v8 = vadd.f32 %v2101_v54, %v2096_v61  ;;  %v2109_v36 = vsel %vm564_vm8, %v2103_v28, 0.0 }
 0x398   :  { %v2110_v32 = vsel %vm564_vm8, %v2104_v26, 0.0  ;;  %v2112_v10 = vsel %vm564_vm8, %v2105_v31, 0.0 }
 0x399   :  { %v2111_v48 = vadd.f32 %v2110_v32, %v2109_v36  ;;  %v2114_v2 = vsel %vm564_vm8, %v2106_v8, 0.0 }
 0x39b   :  { %v2113_v53 = vadd.f32 %v2112_v10, %v2111_v48 }
 0x39d   :  { %v2115_v45 = vadd.f32 %v2114_v2, %v2113_v53 }
 0x39f   :  { %2116 = vadd.xlane.f32.xlu1 %v2115_v45 }
 0x3b0   :  { %2151 = vperm.xlu1 %2449, %v2108_v62  }
 0x3b4   :  { %2165 = vperm.xlu1 %2449, %v2162_v1  }
 0x3b8   :  { %2227 = vperm.xlu1 %2449, %v2428_v4  }
 0x3bc   :  { %2288 = vperm.xlu1 %2449, %v2285_v19  }
 0x42c   :  { %v2117_v25 = vpop.xlane.xlu1 %2116 }
 0x42d   :  { %v2118_v24 = vmul.f32 0.001953125, %v2117_v25 }
 0x42f   :  { %v2119_v15 = vsub.f32 %v2103_v28, %v2118_v24  ;;  %v2120_v55 = vsub.f32 %v2104_v26, %v2118_v24  ;;  %v2121_v60 = vsub.f32 %v2105_v31, %v2118_v24  ;;  %v2122_v40 = vsub.f32 %v2106_v8, %v2118_v24 }
 0x430   :  { %v2152_v51 = vpop.permute.xlu1 %2151 }
 0x431   :  { %v2123_v5 = vmul.f32 %v2119_v15, %v2119_v15  ;;  %v2124_v21 = vmul.f32 %v2120_v55, %v2120_v55  ;;  %v2125_v34 = vmul.f32 %v2121_v60, %v2121_v60  ;;  %v2126_v56 = vmul.f32 %v2122_v40, %v2122_v40 }
 0x433   :  { %v2127_v49 = vsel %vm564_vm8, %v2123_v5, 0.0  ;;  %v2128_v47 = vsel %vm564_vm8, %v2124_v21, 0.0  ;;  %v2130_v3 = vsel %vm564_vm8, %v2125_v34, 0.0  ;;  %v2132_v7 = vsel %vm564_vm8, %v2126_v56, 0.0 }
 0x434   :  { %v2129_v27 = vadd.f32 %v2128_v47, %v2127_v49  ;;  %v2166_v12 = vpop.permute.xlu1 %2165 }
 0x436   :  { %v2131_v16 = vadd.f32 %v2130_v3, %v2129_v27 }
 0x438   :  { %v2133_v50 = vadd.f32 %v2132_v7, %v2131_v16  ;;  %v2228_v25 = vpop.permute.xlu1 %2227 }
 0x43a   :  { %2134 = vadd.xlane.f32.xlu0 %v2133_v50 }
 0x4c7   :  { %v2135_v30 = vpop.xlane.xlu0 %2134 }
 0x4c8   :  { %v2136_v13 = vmul.f32 0.001953125, %v2135_v30 }
 0x4ca   :  { %v2137_v17 = vadd.f32 1e-05, %v2136_v13 }
 0x4cc   :  { %2454 = vrsqrt.f32 %v2137_v17 }
 0x4d6   :  { %v2455_v58 = vpop.eup %2454 }
 0x4d7   :  { %v2139_v6 = vmul.f32 %v2455_v58, %v2107_v38 }
 0x4d9   :  { %2142 = vperm.xlu0 %2448, %v2139_v6  }
 0x4dd   :  { %2196 = vperm.xlu0 %2448, %v2427_v22  }
 0x4e1   :  { %2258 = vperm.xlu0 %2448, %v2429_v63   ;;  %v2289_v63 = vpop.permute.xlu1 %2288 }
 0x558   :  { %v2143_v43 = vpop.permute.xlu0 %2142 }
 0x559   :  { %v2145_v0 = vmul.f32 %v2143_v43, %v2119_v15  ;;  %v2146_v29 = vmul.f32 %v2143_v43, %v2120_v55  ;;  %v2147_v52 = vmul.f32 %v2143_v43, %v2121_v60  ;;  %v2148_v9 = vmul.f32 %v2143_v43, %v2122_v40 }
 0x55b   :  { %v2154_v35 = vadd.f32 %v2152_v51, %v2145_v0  ;;  %v2155_v11 = vadd.f32 %v2152_v51, %v2146_v29  ;;  %v2156_v46 = vadd.f32 %v2152_v51, %v2147_v52  ;;  %v2157_v23 = vadd.f32 %v2152_v51, %v2148_v9 }
 0x55c   :  { %v2197_v18 = vpop.permute.xlu0 %2196 }
 0x55d   :  { %v2158_v59 = vmax.f32 %v2154_v35, 0.0  ;;  %v2159_v57 = vmax.f32 %v2155_v11, 0.0  ;;  %v2160_v33 = vmax.f32 %v2156_v46, 0.0  ;;  %v2161_v20 = vmax.f32 %v2157_v23, 0.0 }
 0x55f   :  { %v2171_v54 = vrot.slane %v2158_v59, %v2696_v37  ;;  %v2175_v14 = vrot.slane %v2159_v57, %v2696_v37  ;;  %v2179_v44 = vrot.slane %v2160_v33, %v2696_v37  ;;  %v2183_v61 = vrot.slane %v2161_v20, %v2696_v37 }
 0x560   :  { %v2202_v28 = vrot.slane %v2158_v59, %v2703_v39  ;;  %v2206_v26 = vrot.slane %v2159_v57, %v2703_v39  ;;  %v2210_v31 = vrot.slane %v2160_v33, %v2703_v39  ;;  %v2214_v8 = vrot.slane %v2161_v20, %v2703_v39  ;;  %v2259_v60 = vpop.permute.xlu0 %2258 }
 0x561   :  { %v2184_v36 = vmul.f32 %v2171_v54, %v2166_v12  ;;  %v2185_v32 = vmul.f32 %v2175_v14, %v2166_v12  ;;  %v2186_v10 = vmul.f32 %v2179_v44, %v2166_v12  ;;  %v2187_v48 = vmul.f32 %v2183_v61, %v2166_v12 }
 0x562   :  { %v2215_v53 = vmul.f32 %v2202_v28, %v2197_v18  ;;  %v2216_v2 = vmul.f32 %v2206_v26, %v2197_v18  ;;  %v2217_v45 = vmul.f32 %v2210_v31, %v2197_v18  ;;  %v2218_v62 = vmul.f32 %v2214_v8, %v2197_v18 }
 0x563   :  { %v2233_v1 = vrot.slane %v2158_v59, %v2710_v41  ;;  %v2237_v37 = vrot.slane %v2159_v57, %v2710_v41  ;;  %v2241_v4 = vrot.slane %v2160_v33, %v2710_v41  ;;  %v2245_v19 = vrot.slane %v2161_v20, %v2710_v41 }
 0x564   :  { %v2219_v24 = vadd.f32 %v2215_v53, %v2184_v36  ;;  %v2220_v15 = vadd.f32 %v2216_v2, %v2185_v32  ;;  %v2221_v39 = vadd.f32 %v2217_v45, %v2186_v10  ;;  %v2222_v55 = vadd.f32 %v2218_v62, %v2187_v48  ;;  %v2296_v48 = vld [vmem:[%s3964_s12] sm:$0xf]  ;;  %s2362_s12 = sshll.u32 %s2499_s20, 4  ;;  %s2363_s12 = int_to_ptr.vmem [resolvable:$true] %s2362_s12 }
 0x565   :  { %v2246_v40 = vmul.f32 %v2233_v1, %v2228_v25  ;;  %v2247_v5 = vmul.f32 %v2237_v37, %v2228_v25  ;;  %v2248_v21 = vmul.f32 %v2241_v4, %v2228_v25  ;;  %v2249_v34 = vmul.f32 %v2245_v19, %v2228_v25  ;;  %v2295_v62 = vld [vmem:[%s3963_s11] sm:$0xf]  ;;  %s2458_s11 = scalar_lea.vmem %s2363_s12, 256  ;;  %p2463_p1 = scmp.lt.s32.totalorder %s2363_s12, %s2363_s12 }
 0x566   :  { %v2264_v56 = vrot.slane %v2158_v59, %v2712_v42  ;;  %v2268_v49 = vrot.slane %v2159_v57, %v2712_v42  ;;  %v2272_v47 = vrot.slane %v2160_v33, %v2712_v42  ;;  %v2276_v27 = vrot.slane %v2161_v20, %v2712_v42  ;;  %p2459_p0 = scmp.ne.s32.totalorder %s2363_s12, %s2458_s11  ;;  %p2464_p2 = scmp.lt.s32.totalorder %s2458_s11, %s2458_s11 }
 0x567   :  { %v2250_v3 = vadd.f32 %v2246_v40, %v2219_v24  ;;  %v2251_v41 = vadd.f32 %v2247_v5, %v2220_v15  ;;  %v2252_v16 = vadd.f32 %v2248_v21, %v2221_v39  ;;  %v2253_v7 = vadd.f32 %v2249_v34, %v2222_v55 }
 0x568   :  { %v2277_v50 = vmul.f32 %v2264_v56, %v2259_v60  ;;  %v2278_v30 = vmul.f32 %v2268_v49, %v2259_v60  ;;  %v2279_v13 = vmul.f32 %v2272_v47, %v2259_v60  ;;  %v2280_v17 = vmul.f32 %v2276_v27, %v2259_v60  ;;  %p2465_p3 = por %p2464_p2, %p2463_p1 }
 0x56a   :  { %v2281_v38 = vadd.f32 %v2277_v50, %v2250_v3  ;;  %v2282_v58 = vadd.f32 %v2278_v30, %v2251_v41  ;;  %v2283_v6 = vadd.f32 %v2279_v13, %v2252_v16  ;;  %v2284_v22 = vadd.f32 %v2280_v17, %v2253_v7  ;;  %p2466_p4 = pnand %p2465_p3, %p2459_p0 }
 0x56c   :  { %v2291_v51 = vadd.f32 %v2289_v63, %v2281_v38  ;;  %v2292_v43 = vadd.f32 %v2289_v63, %v2282_v58  ;;  %v2293_v0 = vadd.f32 %v2289_v63, %v2283_v6  ;;  %v2294_v29 = vadd.f32 %v2289_v63, %v2284_v22 }
 0x56e   :  { %v2297_v52 = vsel %vm564_vm8, %v2291_v51, 0.0  ;;  %v2298_v42 = vsel %vm564_vm8, %v2292_v43, 0.0  ;;  %v2300_v35 = vsel %vm564_vm8, %v2293_v0, 0.0  ;;  %v2302_v46 = vsel %vm564_vm8, %v2294_v29, 0.0 }
 0x56f   :  { %v2299_v9 = vadd.f32 %v2298_v42, %v2297_v52 }
 0x571   :  { %v2301_v11 = vadd.f32 %v2300_v35, %v2299_v9 }
 0x573   :  { %v2303_v23 = vadd.f32 %v2302_v46, %v2301_v11 }
 0x575   :  { %2304 = vadd.xlane.f32.xlu0 %v2303_v23 }
 0x602   :  { %v2305_v59 = vpop.xlane.xlu0 %2304 }
 0x603   :  { %v2306_v57 = vmul.f32 0.001953125, %v2305_v59 }
 0x605   :  { %v2307_v33 = vsub.f32 %v2291_v51, %v2306_v57  ;;  %v2308_v20 = vsub.f32 %v2292_v43, %v2306_v57  ;;  %v2309_v12 = vsub.f32 %v2293_v0, %v2306_v57  ;;  %v2310_v18 = vsub.f32 %v2294_v29, %v2306_v57 }
 0x607   :  { %v2311_v54 = vmul.f32 %v2307_v33, %v2307_v33  ;;  %v2312_v14 = vmul.f32 %v2308_v20, %v2308_v20  ;;  %v2313_v44 = vmul.f32 %v2309_v12, %v2309_v12  ;;  %v2314_v61 = vmul.f32 %v2310_v18, %v2310_v18 }
 0x609   :  { %v2315_v28 = vsel %vm564_vm8, %v2311_v54, 0.0  ;;  %v2316_v26 = vsel %vm564_vm8, %v2312_v14, 0.0  ;;  %v2318_v8 = vsel %vm564_vm8, %v2313_v44, 0.0  ;;  %v2320_v32 = vsel %vm564_vm8, %v2314_v61, 0.0 }
 0x60a   :  { %v2317_v31 = vadd.f32 %v2316_v26, %v2315_v28 }
 0x60c   :  { %v2319_v36 = vadd.f32 %v2318_v8, %v2317_v31 }
 0x60e   :  { %v2321_v10 = vadd.f32 %v2320_v32, %v2319_v36 }
 0x610   :  { %2322 = vadd.xlane.f32.xlu1 %v2321_v10 }
 0x621   :  { %2339 = vperm.xlu1 %2449, %v2296_v48  }
 0x69d   :  { %v2323_v53 = vpop.xlane.xlu1 %2322 }
 0x69e   :  { %v2324_v2 = vmul.f32 0.001953125, %v2323_v53 }
 0x6a0   :  { %v2325_v45 = vadd.f32 1e-05, %v2324_v2 }
 0x6a1   :  { %v2340_v39 = vpop.permute.xlu1 %2339 }
 0x6a2   :  { %2456 = vrsqrt.f32 %v2325_v45 }
 0x6ac   :  { %v2457_v1 = vpop.eup %2456 }
 0x6ad   :  { %v2327_v37 = vmul.f32 %v2457_v1, %v2295_v62 }
 0x6af   :  { %2330 = vperm.xlu0 %2448, %v2327_v37  }
 0x72e   :  { %v2331_v4 = vpop.permute.xlu0 %2330 }
 0x72f   :  { %v2333_v19 = vmul.f32 %v2331_v4, %v2307_v33  ;;  %v2334_v25 = vmul.f32 %v2331_v4, %v2308_v20  ;;  %v2335_v24 = vmul.f32 %v2331_v4, %v2309_v12  ;;  %v2336_v15 = vmul.f32 %v2331_v4, %v2310_v18 }
 0x731   :  { %v2342_v55 = vadd.f32 %v2340_v39, %v2333_v19  ;;  %v2343_v60 = vadd.f32 %v2340_v39, %v2334_v25  ;;  %v2344_v40 = vadd.f32 %v2340_v39, %v2335_v24  ;;  %v2345_v5 = vadd.f32 %v2340_v39, %v2336_v15 }
 0x733   :  { %v2350_v21 = vcombine.low %v2342_v55, %v2343_v60  ;;  %v2351_v34 = vcombine.low %v2344_v40, %v2345_v5 }
 0x735   :  { %2354 = vst [vmem:[#allocation2] sm:$0xff] %v2350_v21  ;;  %2355 = vst [vmem:[#allocation2 + $0x8] sm:$0xff] %v2351_v34 }
 0x736   :  { %2469 = shalt.err (!%p2466_p4)
}
 0x737   :  { %s2470_s22 = scalar_lea.hbm %s3967_s15, 256 }
 0x738   :  { %p2471_p5 = scmp.ne.s32.totalorder %s3967_s15, %s2470_s22  ;;  %p2474_p6 = scmp.lt.u32.totalorder %s2470_s22, %s3967_s15 }
 0x73a   :  { %p2476_p7 = pnand %p2474_p6, %p2471_p5 }
 0x73c   :  { %2479 = shalt.err (!%p2476_p7)
}
 0x73d   :  { %2365 = dma.vmem_to_hbm [thread:$0]  %s2363_s12, 256, %s3967_s15, [#allocation3]  }
 0x73e   :  { %2480 = dma.done.wait [#allocation3], 256  }
 0x73f   :  { %2481 = vsyncadd [#allocation3], 4294967040 }
 0x740   :  { %2369 = vsyncpa [#allocation3], 1 }

</bundles_post_ra>
